<compile_context>
chip_gen: v5e
topology: v5e:2x2
jax: 0.10.0
libtpu: 0.0.40
codegen_flags: <defaults>
</compile_context>

<pallas_src>
import functools

import jax
import jax.numpy as jnp
from jax.experimental import pallas as pl
from jax.experimental.pallas import tpu as pltpu

LANE = 128
# Per-VMEM-buffer budget for the copy tiles (bytes).  Double-buffered in+out
# ~16 MiB of scoped VMEM: safe on v5e/v6e/v7x, and well past the tile size
# where the pure-copy HBM roofline saturates (~85%).
PER_BUFFER_BYTES = 4 * 1024 * 1024


def ss_kernel(chunk_ref, lane_ref, audio_ref, out_ref, *,
              num_attacked, b_tile, chunk_tile):
    """Copy this tile, then zero the attacked samples that land inside it.

    chunk_ref / lane_ref: (B*K,) int32 in SMEM (scalar prefetch): attacked
        positions pre-split into sublane-chunk (idx // 128) and lane (idx % 128).
    audio_ref / out_ref:  (b_tile, chunk_tile, 128) VMEM tiles.
    """
    bi = pl.program_id(0)
    chunk_start = pl.program_id(1) * chunk_tile

    # Bulk path: one lane-dense, unmasked full-tile copy (HBM-bandwidth bound).
    out_ref[...] = audio_ref[...]

    # Hoisted once (JAX does not CSE broadcast_in_dim inside loops).
    lane_iota = jax.lax.broadcasted_iota(jnp.int32, (1, 1, LANE), 2)
    zeros = jnp.zeros((1, 1, LANE), dtype=out_ref.dtype)

    def scatter_row(r, carry):
        base = (bi * b_tile + r) * num_attacked  # flat offset into SMEM arrays

        def zero_one(kk, c):
            flat = base + kk
            local_chunk = chunk_ref[flat] - chunk_start   # sublane chunk in tile
            lane_idx = lane_ref[flat]                     # lane inside the chunk
            in_tile = jnp.logical_and(local_chunk >= 0, local_chunk < chunk_tile)

            @pl.when(in_tile)
            def _():
                # Masked store at a dynamic (row, sublane) offset: no read, no
                # select -- one vst.msk per attacked sample in this tile.
                pltpu.store(
                    out_ref.at[pl.ds(r, 1), pl.ds(local_chunk, 1), :],
                    zeros,
                    mask=(lane_iota == lane_idx))
            return c

        # K is small and static: unroll so the scalar address math and SMEM
        # reads for different k pipeline on the 2-slot scalar unit.
        return jax.lax.fori_loop(0, num_attacked, zero_one, carry,
                                 unroll=True if num_attacked <= 64 else 8)

    jax.lax.fori_loop(0, b_tile, scatter_row, 0, unroll=bool(b_tile <= 8))


def _round_up(x, m):
    return ((x + m - 1) // m) * m


def _choose_tiling(B, C, itemsize):
    """Pick (b_tile, chunk_tile, nb, nc, c_total) under the VMEM budget."""
    row_bytes = C * LANE * itemsize
    if row_bytes <= PER_BUFFER_BYTES:
        # Whole row(s) per block: batch rows to fatten each DMA, preferring a
        # grid with >= 2 steps so both v7x TensorCores stay busy.
        divisors = [d for d in range(1, B + 1)
                    if B % d == 0 and d * row_bytes <= PER_BUFFER_BYTES]
        two_step = [d for d in divisors if B // d >= 2]
        b_tile = max(two_step) if two_step else max(divisors)
        nb = B // b_tile
        chunk_tile, nc = C, 1
        if nb * nc == 1 and C >= 16:
            # Single-step grid (B == 1): split the row into 2 parallel tiles.
            nc = 2
            chunk_tile = _round_up(-(-C // nc), 8)
    else:
        # Long rows: balance the chunk tiles so padding stays < 8*nc chunks
        # instead of rounding C up to a fixed maximum tile size.
        b_tile, nb = 1, B
        max_chunk = max(8, PER_BUFFER_BYTES // (LANE * itemsize))
        nc = -(-C // max_chunk)
        chunk_tile = _round_up(-(-C // nc), 8)
    c_total = nc * chunk_tile
    return b_tile, chunk_tile, nb, nc, c_total


def sample_suppression(audio, attacked_idx):
    """audio: (B, N) float; attacked_idx: (B, K) int32 (distinct per row)."""
    B, N = audio.shape
    _, K = attacked_idx.shape
    if K == 0:
        return audio

    itemsize = jnp.dtype(audio.dtype).itemsize
    C = -(-N // LANE)  # lane chunks per row
    b_tile, chunk_tile, nb, nc, c_total = _choose_tiling(B, C, itemsize)
    n_total = c_total * LANE

    # TODO(synk): handle the ragged (N % 128 != 0) tail fully in-kernel to drop the pad/slice passes.
    audio_p = audio if n_total == N else jnp.pad(audio, ((0, 0), (0, n_total - N)))
    audio_3d = audio_p.reshape(B, c_total, LANE)

    # Pre-split attacked indices (one vectorized pass) and flatten to 1-D so
    # the SMEM prefetch arrays avoid 2-D padding and the kernel does no div/mod.
    idx = attacked_idx.astype(jnp.int32)
    attacked_chunk = (idx // LANE).reshape(-1)
    attacked_lane = (idx % LANE).reshape(-1)

    kernel = functools.partial(ss_kernel, num_attacked=K, b_tile=b_tile,
                               chunk_tile=chunk_tile)

    out_3d = pl.pallas_call(
        kernel,
        out_shape=jax.ShapeDtypeStruct((B, c_total, LANE), audio.dtype),
        grid_spec=pltpu.PrefetchScalarGridSpec(
            num_scalar_prefetch=2,
            grid=(nb, nc),
            in_specs=[pl.BlockSpec((b_tile, chunk_tile, LANE),
                                   lambda bi, ci, ch, ln: (bi, ci, 0))],
            out_specs=pl.BlockSpec((b_tile, chunk_tile, LANE),
                                   lambda bi, ci, ch, ln: (bi, ci, 0)),
        ),
        compiler_params=pltpu.CompilerParams(
            dimension_semantics=("parallel", "parallel"),
            vmem_limit_bytes=32 * 1024 * 1024,
        ),
    )(attacked_chunk, attacked_lane, audio_3d)

    out = out_3d.reshape(B, n_total)
    if n_total != N:
        out = out[:, :N]
    return out


if __name__ == "__main__":
    key = jax.random.PRNGKey(0)
    B, N = 4, 512
    attack_rate = 0.03
    K = int(attack_rate * N)  # 15 attacked samples per row

    k_audio, k_idx = jax.random.split(key)
    audio = jax.random.normal(k_audio, (B, N), dtype=jnp.float32)

    # Deterministic stand-in for np.random.choice(range(N), K, replace=False):
    # independent per-row permutations, take the first K indices.
    row_keys = jax.random.split(k_idx, B)
    attacked_idx = jnp.stack(
        [jax.random.permutation(rk, N)[:K] for rk in row_keys]
    ).astype(jnp.int32)

    out = jax.block_until_ready(sample_suppression(audio, attacked_idx))

    # Reference check (pure JAX scatter of zeros at the attacked indices).
    ref = audio.at[jnp.arange(B)[:, None], attacked_idx].set(0.0)
    assert out.shape == audio.shape and out.dtype == audio.dtype
    assert bool(jnp.allclose(out, ref)), "mismatch vs reference scatter"

    print("KERNEL_OK")
</pallas_src>

<mosaic_0001>
module attributes {stable_mosaic.version = 11 : i64} {
  func.func @ss_kernel(%arg0: i32, %arg1: i32, %arg2: memref<60xi32, #tpu.memory_space<smem>>, %arg3: memref<60xi32, #tpu.memory_space<smem>>, %arg4: memref<2x4x128xf32, #tpu.memory_space<vmem>>, %arg5: memref<2x4x128xf32, #tpu.memory_space<vmem>>) attributes {dimension_semantics = [#tpu.dimension_semantics<parallel>, #tpu.dimension_semantics<parallel>], iteration_bounds = array<i64: 2, 1>, scalar_prefetch = 2 : i64, scratch_operands = 0 : i64, tpu.core_type = #tpu.core_type<tc>, window_params = [{transform_indices = @transform_0, window_bounds = array<i64: 2, 4, 128>}, {transform_indices = @transform_1, window_bounds = array<i64: 2, 4, 128>}]} {
    %c4_i32 = arith.constant 4 : i32
    %0 = arith.muli %arg1, %c4_i32 : i32
    %c0 = arith.constant 0 : index
    %c0_0 = arith.constant 0 : index
    %c0_1 = arith.constant 0 : index
    %1 = vector.load %arg4[%c0, %c0_0, %c0_1] : memref<2x4x128xf32, #tpu.memory_space<vmem>>, vector<2x4x128xf32>
    %c0_2 = arith.constant 0 : index
    %c0_3 = arith.constant 0 : index
    %c0_4 = arith.constant 0 : index
    %2 = vector.load %arg5[%c0_2, %c0_3, %c0_4] : memref<2x4x128xf32, #tpu.memory_space<vmem>>, vector<2x4x128xf32>
    tpu.vector_store %arg5[%c0_2, %c0_3, %c0_4], %1 {strides = array<i32>} : memref<2x4x128xf32, #tpu.memory_space<vmem>>, vector<2x4x128xf32>,
    %3 = tpu.iota {dimensions = array<i32: 2>} : vector<1x1x128xi32>
    %cst = arith.constant 0.000000e+00 : f32
    %4 = vector.broadcast %cst : f32 to vector<1x1x128xf32>
    %c0_i32 = arith.constant 0 : i32
    %c2_i32 = arith.constant 2 : i32
    %5 = arith.muli %arg0, %c2_i32 : i32
    %6 = arith.addi %5, %c0_i32 : i32
    %c15_i32 = arith.constant 15 : i32
    %7 = arith.muli %6, %c15_i32 : i32
    %c0_i32_5 = arith.constant 0 : i32
    %8 = arith.addi %7, %c0_i32_5 : i32
    %9 = arith.index_cast %8 : i32 to index
    %10 = memref.load %arg2[%9] : memref<60xi32, #tpu.memory_space<smem>>
    %11 = arith.subi %10, %0 : i32
    %12 = arith.index_cast %8 : i32 to index
    %13 = memref.load %arg3[%12] : memref<60xi32, #tpu.memory_space<smem>>
    %c0_i32_6 = arith.constant 0 : i32
    %14 = arith.cmpi sge, %11, %c0_i32_6 : i32
    %c4_i32_7 = arith.constant 4 : i32
    %15 = arith.cmpi slt, %11, %c4_i32_7 : i32
    %16 = arith.andi %14, %15 : i1
    %17 = arith.extui %16 : i1 to i32
    %c0_i32_8 = arith.constant 0 : i32
    %18 = arith.cmpi ne, %17, %c0_i32_8 : i32
    scf.if %18 {
      %341 = vector.broadcast %13 : i32 to vector<1x1x128xi32>
      %342 = arith.cmpi eq, %3, %341 : vector<1x1x128xi32>
      %343 = arith.index_cast %c0_i32 : i32 to index
      %344 = arith.index_cast %11 : i32 to index
      %c0_119 = arith.constant 0 : index
      %345 = vector.load %arg5[%343, %344, %c0_119] : memref<2x4x128xf32, #tpu.memory_space<vmem>>, vector<1x1x128xf32>
      tpu.vector_store %arg5[%343, %344, %c0_119], %4 masked %342 {strides = array<i32>} : memref<2x4x128xf32, #tpu.memory_space<vmem>>, vector<1x1x128xf32>, vector<1x1x128xi1>
    } else {
    }
    %c1_i32 = arith.constant 1 : i32
    %19 = arith.addi %7, %c1_i32 : i32
    %20 = arith.index_cast %19 : i32 to index
    %21 = memref.load %arg2[%20] : memref<60xi32, #tpu.memory_space<smem>>
    %22 = arith.subi %21, %0 : i32
    %23 = arith.index_cast %19 : i32 to index
    %24 = memref.load %arg3[%23] : memref<60xi32, #tpu.memory_space<smem>>
    %c0_i32_9 = arith.constant 0 : i32
    %25 = arith.cmpi sge, %22, %c0_i32_9 : i32
    %c4_i32_10 = arith.constant 4 : i32
    %26 = arith.cmpi slt, %22, %c4_i32_10 : i32
    %27 = arith.andi %25, %26 : i1
    %28 = arith.extui %27 : i1 to i32
    %c0_i32_11 = arith.constant 0 : i32
    %29 = arith.cmpi ne, %28, %c0_i32_11 : i32
    scf.if %29 {
      %341 = vector.broadcast %24 : i32 to vector<1x1x128xi32>
      %342 = arith.cmpi eq, %3, %341 : vector<1x1x128xi32>
      %343 = arith.index_cast %c0_i32 : i32 to index
      %344 = arith.index_cast %22 : i32 to index
      %c0_119 = arith.constant 0 : index
      %345 = vector.load %arg5[%343, %344, %c0_119] : memref<2x4x128xf32, #tpu.memory_space<vmem>>, vector<1x1x128xf32>
      tpu.vector_store %arg5[%343, %344, %c0_119], %4 masked %342 {strides = array<i32>} : memref<2x4x128xf32, #tpu.memory_space<vmem>>, vector<1x1x128xf32>, vector<1x1x128xi1>
    } else {
    }
    %c2_i32_12 = arith.constant 2 : i32
    %30 = arith.addi %7, %c2_i32_12 : i32
    %31 = arith.index_cast %30 : i32 to index
    %32 = memref.load %arg2[%31] : memref<60xi32, #tpu.memory_space<smem>>
    %33 = arith.subi %32, %0 : i32
    %34 = arith.index_cast %30 : i32 to index
    %35 = memref.load %arg3[%34] : memref<60xi32, #tpu.memory_space<smem>>
    %c0_i32_13 = arith.constant 0 : i32
    %36 = arith.cmpi sge, %33, %c0_i32_13 : i32
    %c4_i32_14 = arith.constant 4 : i32
    %37 = arith.cmpi slt, %33, %c4_i32_14 : i32
    %38 = arith.andi %36, %37 : i1
    %39 = arith.extui %38 : i1 to i32
    %c0_i32_15 = arith.constant 0 : i32
    %40 = arith.cmpi ne, %39, %c0_i32_15 : i32
    scf.if %40 {
      %341 = vector.broadcast %35 : i32 to vector<1x1x128xi32>
      %342 = arith.cmpi eq, %3, %341 : vector<1x1x128xi32>
      %343 = arith.index_cast %c0_i32 : i32 to index
      %344 = arith.index_cast %33 : i32 to index
      %c0_119 = arith.constant 0 : index
      %345 = vector.load %arg5[%343, %344, %c0_119] : memref<2x4x128xf32, #tpu.memory_space<vmem>>, vector<1x1x128xf32>
      tpu.vector_store %arg5[%343, %344, %c0_119], %4 masked %342 {strides = array<i32>} : memref<2x4x128xf32, #tpu.memory_space<vmem>>, vector<1x1x128xf32>, vector<1x1x128xi1>
    } else {
    }
    %c3_i32 = arith.constant 3 : i32
    %41 = arith.addi %7, %c3_i32 : i32
    %42 = arith.index_cast %41 : i32 to index
    %43 = memref.load %arg2[%42] : memref<60xi32, #tpu.memory_space<smem>>
    %44 = arith.subi %43, %0 : i32
    %45 = arith.index_cast %41 : i32 to index
    %46 = memref.load %arg3[%45] : memref<60xi32, #tpu.memory_space<smem>>
    %c0_i32_16 = arith.constant 0 : i32
    %47 = arith.cmpi sge, %44, %c0_i32_16 : i32
    %c4_i32_17 = arith.constant 4 : i32
    %48 = arith.cmpi slt, %44, %c4_i32_17 : i32
    %49 = arith.andi %47, %48 : i1
    %50 = arith.extui %49 : i1 to i32
    %c0_i32_18 = arith.constant 0 : i32
    %51 = arith.cmpi ne, %50, %c0_i32_18 : i32
    scf.if %51 {
      %341 = vector.broadcast %46 : i32 to vector<1x1x128xi32>
      %342 = arith.cmpi eq, %3, %341 : vector<1x1x128xi32>
      %343 = arith.index_cast %c0_i32 : i32 to index
      %344 = arith.index_cast %44 : i32 to index
      %c0_119 = arith.constant 0 : index
      %345 = vector.load %arg5[%343, %344, %c0_119] : memref<2x4x128xf32, #tpu.memory_space<vmem>>, vector<1x1x128xf32>
      tpu.vector_store %arg5[%343, %344, %c0_119], %4 masked %342 {strides = array<i32>} : memref<2x4x128xf32, #tpu.memory_space<vmem>>, vector<1x1x128xf32>, vector<1x1x128xi1>
    } else {
    }
    %c4_i32_19 = arith.constant 4 : i32
    %52 = arith.addi %7, %c4_i32_19 : i32
    %53 = arith.index_cast %52 : i32 to index
    %54 = memref.load %arg2[%53] : memref<60xi32, #tpu.memory_space<smem>>
    %55 = arith.subi %54, %0 : i32
    %56 = arith.index_cast %52 : i32 to index
    %57 = memref.load %arg3[%56] : memref<60xi32, #tpu.memory_space<smem>>
    %c0_i32_20 = arith.constant 0 : i32
    %58 = arith.cmpi sge, %55, %c0_i32_20 : i32
    %c4_i32_21 = arith.constant 4 : i32
    %59 = arith.cmpi slt, %55, %c4_i32_21 : i32
    %60 = arith.andi %58, %59 : i1
    %61 = arith.extui %60 : i1 to i32
    %c0_i32_22 = arith.constant 0 : i32
    %62 = arith.cmpi ne, %61, %c0_i32_22 : i32
    scf.if %62 {
      %341 = vector.broadcast %57 : i32 to vector<1x1x128xi32>
      %342 = arith.cmpi eq, %3, %341 : vector<1x1x128xi32>
      %343 = arith.index_cast %c0_i32 : i32 to index
      %344 = arith.index_cast %55 : i32 to index
      %c0_119 = arith.constant 0 : index
      %345 = vector.load %arg5[%343, %344, %c0_119] : memref<2x4x128xf32, #tpu.memory_space<vmem>>, vector<1x1x128xf32>
      tpu.vector_store %arg5[%343, %344, %c0_119], %4 masked %342 {strides = array<i32>} : memref<2x4x128xf32, #tpu.memory_space<vmem>>, vector<1x1x128xf32>, vector<1x1x128xi1>
    } else {
    }
    %c5_i32 = arith.constant 5 : i32
    %63 = arith.addi %7, %c5_i32 : i32
    %64 = arith.index_cast %63 : i32 to index
    %65 = memref.load %arg2[%64] : memref<60xi32, #tpu.memory_space<smem>>
    %66 = arith.subi %65, %0 : i32
    %67 = arith.index_cast %63 : i32 to index
    %68 = memref.load %arg3[%67] : memref<60xi32, #tpu.memory_space<smem>>
    %c0_i32_23 = arith.constant 0 : i32
    %69 = arith.cmpi sge, %66, %c0_i32_23 : i32
    %c4_i32_24 = arith.constant 4 : i32
    %70 = arith.cmpi slt, %66, %c4_i32_24 : i32
    %71 = arith.andi %69, %70 : i1
    %72 = arith.extui %71 : i1 to i32
    %c0_i32_25 = arith.constant 0 : i32
    %73 = arith.cmpi ne, %72, %c0_i32_25 : i32
    scf.if %73 {
      %341 = vector.broadcast %68 : i32 to vector<1x1x128xi32>
      %342 = arith.cmpi eq, %3, %341 : vector<1x1x128xi32>
      %343 = arith.index_cast %c0_i32 : i32 to index
      %344 = arith.index_cast %66 : i32 to index
      %c0_119 = arith.constant 0 : index
      %345 = vector.load %arg5[%343, %344, %c0_119] : memref<2x4x128xf32, #tpu.memory_space<vmem>>, vector<1x1x128xf32>
      tpu.vector_store %arg5[%343, %344, %c0_119], %4 masked %342 {strides = array<i32>} : memref<2x4x128xf32, #tpu.memory_space<vmem>>, vector<1x1x128xf32>, vector<1x1x128xi1>
    } else {
    }
    %c6_i32 = arith.constant 6 : i32
    %74 = arith.addi %7, %c6_i32 : i32
    %75 = arith.index_cast %74 : i32 to index
    %76 = memref.load %arg2[%75] : memref<60xi32, #tpu.memory_space<smem>>
    %77 = arith.subi %76, %0 : i32
    %78 = arith.index_cast %74 : i32 to index
    %79 = memref.load %arg3[%78] : memref<60xi32, #tpu.memory_space<smem>>
    %c0_i32_26 = arith.constant 0 : i32
    %80 = arith.cmpi sge, %77, %c0_i32_26 : i32
    %c4_i32_27 = arith.constant 4 : i32
    %81 = arith.cmpi slt, %77, %c4_i32_27 : i32
    %82 = arith.andi %80, %81 : i1
    %83 = arith.extui %82 : i1 to i32
    %c0_i32_28 = arith.constant 0 : i32
    %84 = arith.cmpi ne, %83, %c0_i32_28 : i32
    scf.if %84 {
      %341 = vector.broadcast %79 : i32 to vector<1x1x128xi32>
      %342 = arith.cmpi eq, %3, %341 : vector<1x1x128xi32>
      %343 = arith.index_cast %c0_i32 : i32 to index
      %344 = arith.index_cast %77 : i32 to index
      %c0_119 = arith.constant 0 : index
      %345 = vector.load %arg5[%343, %344, %c0_119] : memref<2x4x128xf32, #tpu.memory_space<vmem>>, vector<1x1x128xf32>
      tpu.vector_store %arg5[%343, %344, %c0_119], %4 masked %342 {strides = array<i32>} : memref<2x4x128xf32, #tpu.memory_space<vmem>>, vector<1x1x128xf32>, vector<1x1x128xi1>
    } else {
    }
    %c7_i32 = arith.constant 7 : i32
    %85 = arith.addi %7, %c7_i32 : i32
    %86 = arith.index_cast %85 : i32 to index
    %87 = memref.load %arg2[%86] : memref<60xi32, #tpu.memory_space<smem>>
    %88 = arith.subi %87, %0 : i32
    %89 = arith.index_cast %85 : i32 to index
    %90 = memref.load %arg3[%89] : memref<60xi32, #tpu.memory_space<smem>>
    %c0_i32_29 = arith.constant 0 : i32
    %91 = arith.cmpi sge, %88, %c0_i32_29 : i32
    %c4_i32_30 = arith.constant 4 : i32
    %92 = arith.cmpi slt, %88, %c4_i32_30 : i32
    %93 = arith.andi %91, %92 : i1
    %94 = arith.extui %93 : i1 to i32
    %c0_i32_31 = arith.constant 0 : i32
    %95 = arith.cmpi ne, %94, %c0_i32_31 : i32
    scf.if %95 {
      %341 = vector.broadcast %90 : i32 to vector<1x1x128xi32>
      %342 = arith.cmpi eq, %3, %341 : vector<1x1x128xi32>
      %343 = arith.index_cast %c0_i32 : i32 to index
      %344 = arith.index_cast %88 : i32 to index
      %c0_119 = arith.constant 0 : index
      %345 = vector.load %arg5[%343, %344, %c0_119] : memref<2x4x128xf32, #tpu.memory_space<vmem>>, vector<1x1x128xf32>
      tpu.vector_store %arg5[%343, %344, %c0_119], %4 masked %342 {strides = array<i32>} : memref<2x4x128xf32, #tpu.memory_space<vmem>>, vector<1x1x128xf32>, vector<1x1x128xi1>
    } else {
    }
    %c8_i32 = arith.constant 8 : i32
    %96 = arith.addi %7, %c8_i32 : i32
    %97 = arith.index_cast %96 : i32 to index
    %98 = memref.load %arg2[%97] : memref<60xi32, #tpu.memory_space<smem>>
    %99 = arith.subi %98, %0 : i32
    %100 = arith.index_cast %96 : i32 to index
    %101 = memref.load %arg3[%100] : memref<60xi32, #tpu.memory_space<smem>>
    %c0_i32_32 = arith.constant 0 : i32
    %102 = arith.cmpi sge, %99, %c0_i32_32 : i32
    %c4_i32_33 = arith.constant 4 : i32
    %103 = arith.cmpi slt, %99, %c4_i32_33 : i32
    %104 = arith.andi %102, %103 : i1
    %105 = arith.extui %104 : i1 to i32
    %c0_i32_34 = arith.constant 0 : i32
    %106 = arith.cmpi ne, %105, %c0_i32_34 : i32
    scf.if %106 {
      %341 = vector.broadcast %101 : i32 to vector<1x1x128xi32>
      %342 = arith.cmpi eq, %3, %341 : vector<1x1x128xi32>
      %343 = arith.index_cast %c0_i32 : i32 to index
      %344 = arith.index_cast %99 : i32 to index
      %c0_119 = arith.constant 0 : index
      %345 = vector.load %arg5[%343, %344, %c0_119] : memref<2x4x128xf32, #tpu.memory_space<vmem>>, vector<1x1x128xf32>
      tpu.vector_store %arg5[%343, %344, %c0_119], %4 masked %342 {strides = array<i32>} : memref<2x4x128xf32, #tpu.memory_space<vmem>>, vector<1x1x128xf32>, vector<1x1x128xi1>
    } else {
    }
    %c9_i32 = arith.constant 9 : i32
    %107 = arith.addi %7, %c9_i32 : i32
    %108 = arith.index_cast %107 : i32 to index
    %109 = memref.load %arg2[%108] : memref<60xi32, #tpu.memory_space<smem>>
    %110 = arith.subi %109, %0 : i32
    %111 = arith.index_cast %107 : i32 to index
    %112 = memref.load %arg3[%111] : memref<60xi32, #tpu.memory_space<smem>>
    %c0_i32_35 = arith.constant 0 : i32
    %113 = arith.cmpi sge, %110, %c0_i32_35 : i32
    %c4_i32_36 = arith.constant 4 : i32
    %114 = arith.cmpi slt, %110, %c4_i32_36 : i32
    %115 = arith.andi %113, %114 : i1
    %116 = arith.extui %115 : i1 to i32
    %c0_i32_37 = arith.constant 0 : i32
    %117 = arith.cmpi ne, %116, %c0_i32_37 : i32
    scf.if %117 {
      %341 = vector.broadcast %112 : i32 to vector<1x1x128xi32>
      %342 = arith.cmpi eq, %3, %341 : vector<1x1x128xi32>
      %343 = arith.index_cast %c0_i32 : i32 to index
      %344 = arith.index_cast %110 : i32 to index
      %c0_119 = arith.constant 0 : index
      %345 = vector.load %arg5[%343, %344, %c0_119] : memref<2x4x128xf32, #tpu.memory_space<vmem>>, vector<1x1x128xf32>
      tpu.vector_store %arg5[%343, %344, %c0_119], %4 masked %342 {strides = array<i32>} : memref<2x4x128xf32, #tpu.memory_space<vmem>>, vector<1x1x128xf32>, vector<1x1x128xi1>
    } else {
    }
    %c10_i32 = arith.constant 10 : i32
    %118 = arith.addi %7, %c10_i32 : i32
    %119 = arith.index_cast %118 : i32 to index
    %120 = memref.load %arg2[%119] : memref<60xi32, #tpu.memory_space<smem>>
    %121 = arith.subi %120, %0 : i32
    %122 = arith.index_cast %118 : i32 to index
    %123 = memref.load %arg3[%122] : memref<60xi32, #tpu.memory_space<smem>>
    %c0_i32_38 = arith.constant 0 : i32
    %124 = arith.cmpi sge, %121, %c0_i32_38 : i32
    %c4_i32_39 = arith.constant 4 : i32
    %125 = arith.cmpi slt, %121, %c4_i32_39 : i32
    %126 = arith.andi %124, %125 : i1
    %127 = arith.extui %126 : i1 to i32
    %c0_i32_40 = arith.constant 0 : i32
    %128 = arith.cmpi ne, %127, %c0_i32_40 : i32
    scf.if %128 {
      %341 = vector.broadcast %123 : i32 to vector<1x1x128xi32>
      %342 = arith.cmpi eq, %3, %341 : vector<1x1x128xi32>
      %343 = arith.index_cast %c0_i32 : i32 to index
      %344 = arith.index_cast %121 : i32 to index
      %c0_119 = arith.constant 0 : index
      %345 = vector.load %arg5[%343, %344, %c0_119] : memref<2x4x128xf32, #tpu.memory_space<vmem>>, vector<1x1x128xf32>
      tpu.vector_store %arg5[%343, %344, %c0_119], %4 masked %342 {strides = array<i32>} : memref<2x4x128xf32, #tpu.memory_space<vmem>>, vector<1x1x128xf32>, vector<1x1x128xi1>
    } else {
    }
    %c11_i32 = arith.constant 11 : i32
    %129 = arith.addi %7, %c11_i32 : i32
    %130 = arith.index_cast %129 : i32 to index
    %131 = memref.load %arg2[%130] : memref<60xi32, #tpu.memory_space<smem>>
    %132 = arith.subi %131, %0 : i32
    %133 = arith.index_cast %129 : i32 to index
    %134 = memref.load %arg3[%133] : memref<60xi32, #tpu.memory_space<smem>>
    %c0_i32_41 = arith.constant 0 : i32
    %135 = arith.cmpi sge, %132, %c0_i32_41 : i32
    %c4_i32_42 = arith.constant 4 : i32
    %136 = arith.cmpi slt, %132, %c4_i32_42 : i32
    %137 = arith.andi %135, %136 : i1
    %138 = arith.extui %137 : i1 to i32
    %c0_i32_43 = arith.constant 0 : i32
    %139 = arith.cmpi ne, %138, %c0_i32_43 : i32
    scf.if %139 {
      %341 = vector.broadcast %134 : i32 to vector<1x1x128xi32>
      %342 = arith.cmpi eq, %3, %341 : vector<1x1x128xi32>
      %343 = arith.index_cast %c0_i32 : i32 to index
      %344 = arith.index_cast %132 : i32 to index
      %c0_119 = arith.constant 0 : index
      %345 = vector.load %arg5[%343, %344, %c0_119] : memref<2x4x128xf32, #tpu.memory_space<vmem>>, vector<1x1x128xf32>
      tpu.vector_store %arg5[%343, %344, %c0_119], %4 masked %342 {strides = array<i32>} : memref<2x4x128xf32, #tpu.memory_space<vmem>>, vector<1x1x128xf32>, vector<1x1x128xi1>
    } else {
    }
    %c12_i32 = arith.constant 12 : i32
    %140 = arith.addi %7, %c12_i32 : i32
    %141 = arith.index_cast %140 : i32 to index
    %142 = memref.load %arg2[%141] : memref<60xi32, #tpu.memory_space<smem>>
    %143 = arith.subi %142, %0 : i32
    %144 = arith.index_cast %140 : i32 to index
    %145 = memref.load %arg3[%144] : memref<60xi32, #tpu.memory_space<smem>>
    %c0_i32_44 = arith.constant 0 : i32
    %146 = arith.cmpi sge, %143, %c0_i32_44 : i32
    %c4_i32_45 = arith.constant 4 : i32
    %147 = arith.cmpi slt, %143, %c4_i32_45 : i32
    %148 = arith.andi %146, %147 : i1
    %149 = arith.extui %148 : i1 to i32
    %c0_i32_46 = arith.constant 0 : i32
    %150 = arith.cmpi ne, %149, %c0_i32_46 : i32
    scf.if %150 {
      %341 = vector.broadcast %145 : i32 to vector<1x1x128xi32>
      %342 = arith.cmpi eq, %3, %341 : vector<1x1x128xi32>
      %343 = arith.index_cast %c0_i32 : i32 to index
      %344 = arith.index_cast %143 : i32 to index
      %c0_119 = arith.constant 0 : index
      %345 = vector.load %arg5[%343, %344, %c0_119] : memref<2x4x128xf32, #tpu.memory_space<vmem>>, vector<1x1x128xf32>
      tpu.vector_store %arg5[%343, %344, %c0_119], %4 masked %342 {strides = array<i32>} : memref<2x4x128xf32, #tpu.memory_space<vmem>>, vector<1x1x128xf32>, vector<1x1x128xi1>
    } else {
    }
    %c13_i32 = arith.constant 13 : i32
    %151 = arith.addi %7, %c13_i32 : i32
    %152 = arith.index_cast %151 : i32 to index
    %153 = memref.load %arg2[%152] : memref<60xi32, #tpu.memory_space<smem>>
    %154 = arith.subi %153, %0 : i32
    %155 = arith.index_cast %151 : i32 to index
    %156 = memref.load %arg3[%155] : memref<60xi32, #tpu.memory_space<smem>>
    %c0_i32_47 = arith.constant 0 : i32
    %157 = arith.cmpi sge, %154, %c0_i32_47 : i32
    %c4_i32_48 = arith.constant 4 : i32
    %158 = arith.cmpi slt, %154, %c4_i32_48 : i32
    %159 = arith.andi %157, %158 : i1
    %160 = arith.extui %159 : i1 to i32
    %c0_i32_49 = arith.constant 0 : i32
    %161 = arith.cmpi ne, %160, %c0_i32_49 : i32
    scf.if %161 {
      %341 = vector.broadcast %156 : i32 to vector<1x1x128xi32>
      %342 = arith.cmpi eq, %3, %341 : vector<1x1x128xi32>
      %343 = arith.index_cast %c0_i32 : i32 to index
      %344 = arith.index_cast %154 : i32 to index
      %c0_119 = arith.constant 0 : index
      %345 = vector.load %arg5[%343, %344, %c0_119] : memref<2x4x128xf32, #tpu.memory_space<vmem>>, vector<1x1x128xf32>
      tpu.vector_store %arg5[%343, %344, %c0_119], %4 masked %342 {strides = array<i32>} : memref<2x4x128xf32, #tpu.memory_space<vmem>>, vector<1x1x128xf32>, vector<1x1x128xi1>
    } else {
    }
    %c14_i32 = arith.constant 14 : i32
    %162 = arith.addi %7, %c14_i32 : i32
    %163 = arith.index_cast %162 : i32 to index
    %164 = memref.load %arg2[%163] : memref<60xi32, #tpu.memory_space<smem>>
    %165 = arith.subi %164, %0 : i32
    %166 = arith.index_cast %162 : i32 to index
    %167 = memref.load %arg3[%166] : memref<60xi32, #tpu.memory_space<smem>>
    %c0_i32_50 = arith.constant 0 : i32
    %168 = arith.cmpi sge, %165, %c0_i32_50 : i32
    %c4_i32_51 = arith.constant 4 : i32
    %169 = arith.cmpi slt, %165, %c4_i32_51 : i32
    %170 = arith.andi %168, %169 : i1
    %171 = arith.extui %170 : i1 to i32
    %c0_i32_52 = arith.constant 0 : i32
    %172 = arith.cmpi ne, %171, %c0_i32_52 : i32
    scf.if %172 {
      %341 = vector.broadcast %167 : i32 to vector<1x1x128xi32>
      %342 = arith.cmpi eq, %3, %341 : vector<1x1x128xi32>
      %343 = arith.index_cast %c0_i32 : i32 to index
      %344 = arith.index_cast %165 : i32 to index
      %c0_119 = arith.constant 0 : index
      %345 = vector.load %arg5[%343, %344, %c0_119] : memref<2x4x128xf32, #tpu.memory_space<vmem>>, vector<1x1x128xf32>
      tpu.vector_store %arg5[%343, %344, %c0_119], %4 masked %342 {strides = array<i32>} : memref<2x4x128xf32, #tpu.memory_space<vmem>>, vector<1x1x128xf32>, vector<1x1x128xi1>
    } else {
    }
    %c15_i32_53 = arith.constant 15 : i32
    %c1_i32_54 = arith.constant 1 : i32
    %c2_i32_55 = arith.constant 2 : i32
    %173 = arith.muli %arg0, %c2_i32_55 : i32
    %174 = arith.addi %173, %c1_i32_54 : i32
    %c15_i32_56 = arith.constant 15 : i32
    %175 = arith.muli %174, %c15_i32_56 : i32
    %c0_i32_57 = arith.constant 0 : i32
    %176 = arith.addi %175, %c0_i32_57 : i32
    %177 = arith.index_cast %176 : i32 to index
    %178 = memref.load %arg2[%177] : memref<60xi32, #tpu.memory_space<smem>>
    %179 = arith.subi %178, %0 : i32
    %180 = arith.index_cast %176 : i32 to index
    %181 = memref.load %arg3[%180] : memref<60xi32, #tpu.memory_space<smem>>
    %c0_i32_58 = arith.constant 0 : i32
    %182 = arith.cmpi sge, %179, %c0_i32_58 : i32
    %c4_i32_59 = arith.constant 4 : i32
    %183 = arith.cmpi slt, %179, %c4_i32_59 : i32
    %184 = arith.andi %182, %183 : i1
    %185 = arith.extui %184 : i1 to i32
    %c0_i32_60 = arith.constant 0 : i32
    %186 = arith.cmpi ne, %185, %c0_i32_60 : i32
    scf.if %186 {
      %341 = vector.broadcast %181 : i32 to vector<1x1x128xi32>
      %342 = arith.cmpi eq, %3, %341 : vector<1x1x128xi32>
      %343 = arith.index_cast %c1_i32_54 : i32 to index
      %344 = arith.index_cast %179 : i32 to index
      %c0_119 = arith.constant 0 : index
      %345 = vector.load %arg5[%343, %344, %c0_119] : memref<2x4x128xf32, #tpu.memory_space<vmem>>, vector<1x1x128xf32>
      tpu.vector_store %arg5[%343, %344, %c0_119], %4 masked %342 {strides = array<i32>} : memref<2x4x128xf32, #tpu.memory_space<vmem>>, vector<1x1x128xf32>, vector<1x1x128xi1>
    } else {
    }
    %c1_i32_61 = arith.constant 1 : i32
    %187 = arith.addi %175, %c1_i32_61 : i32
    %188 = arith.index_cast %187 : i32 to index
    %189 = memref.load %arg2[%188] : memref<60xi32, #tpu.memory_space<smem>>
    %190 = arith.subi %189, %0 : i32
    %191 = arith.index_cast %187 : i32 to index
    %192 = memref.load %arg3[%191] : memref<60xi32, #tpu.memory_space<smem>>
    %c0_i32_62 = arith.constant 0 : i32
    %193 = arith.cmpi sge, %190, %c0_i32_62 : i32
    %c4_i32_63 = arith.constant 4 : i32
    %194 = arith.cmpi slt, %190, %c4_i32_63 : i32
    %195 = arith.andi %193, %194 : i1
    %196 = arith.extui %195 : i1 to i32
    %c0_i32_64 = arith.constant 0 : i32
    %197 = arith.cmpi ne, %196, %c0_i32_64 : i32
    scf.if %197 {
      %341 = vector.broadcast %192 : i32 to vector<1x1x128xi32>
      %342 = arith.cmpi eq, %3, %341 : vector<1x1x128xi32>
      %343 = arith.index_cast %c1_i32_54 : i32 to index
      %344 = arith.index_cast %190 : i32 to index
      %c0_119 = arith.constant 0 : index
      %345 = vector.load %arg5[%343, %344, %c0_119] : memref<2x4x128xf32, #tpu.memory_space<vmem>>, vector<1x1x128xf32>
      tpu.vector_store %arg5[%343, %344, %c0_119], %4 masked %342 {strides = array<i32>} : memref<2x4x128xf32, #tpu.memory_space<vmem>>, vector<1x1x128xf32>, vector<1x1x128xi1>
    } else {
    }
    %c2_i32_65 = arith.constant 2 : i32
    %198 = arith.addi %175, %c2_i32_65 : i32
    %199 = arith.index_cast %198 : i32 to index
    %200 = memref.load %arg2[%199] : memref<60xi32, #tpu.memory_space<smem>>
    %201 = arith.subi %200, %0 : i32
    %202 = arith.index_cast %198 : i32 to index
    %203 = memref.load %arg3[%202] : memref<60xi32, #tpu.memory_space<smem>>
    %c0_i32_66 = arith.constant 0 : i32
    %204 = arith.cmpi sge, %201, %c0_i32_66 : i32
    %c4_i32_67 = arith.constant 4 : i32
    %205 = arith.cmpi slt, %201, %c4_i32_67 : i32
    %206 = arith.andi %204, %205 : i1
    %207 = arith.extui %206 : i1 to i32
    %c0_i32_68 = arith.constant 0 : i32
    %208 = arith.cmpi ne, %207, %c0_i32_68 : i32
    scf.if %208 {
      %341 = vector.broadcast %203 : i32 to vector<1x1x128xi32>
      %342 = arith.cmpi eq, %3, %341 : vector<1x1x128xi32>
      %343 = arith.index_cast %c1_i32_54 : i32 to index
      %344 = arith.index_cast %201 : i32 to index
      %c0_119 = arith.constant 0 : index
      %345 = vector.load %arg5[%343, %344, %c0_119] : memref<2x4x128xf32, #tpu.memory_space<vmem>>, vector<1x1x128xf32>
      tpu.vector_store %arg5[%343, %344, %c0_119], %4 masked %342 {strides = array<i32>} : memref<2x4x128xf32, #tpu.memory_space<vmem>>, vector<1x1x128xf32>, vector<1x1x128xi1>
    } else {
    }
    %c3_i32_69 = arith.constant 3 : i32
    %209 = arith.addi %175, %c3_i32_69 : i32
    %210 = arith.index_cast %209 : i32 to index
    %211 = memref.load %arg2[%210] : memref<60xi32, #tpu.memory_space<smem>>
    %212 = arith.subi %211, %0 : i32
    %213 = arith.index_cast %209 : i32 to index
    %214 = memref.load %arg3[%213] : memref<60xi32, #tpu.memory_space<smem>>
    %c0_i32_70 = arith.constant 0 : i32
    %215 = arith.cmpi sge, %212, %c0_i32_70 : i32
    %c4_i32_71 = arith.constant 4 : i32
    %216 = arith.cmpi slt, %212, %c4_i32_71 : i32
    %217 = arith.andi %215, %216 : i1
    %218 = arith.extui %217 : i1 to i32
    %c0_i32_72 = arith.constant 0 : i32
    %219 = arith.cmpi ne, %218, %c0_i32_72 : i32
    scf.if %219 {
      %341 = vector.broadcast %214 : i32 to vector<1x1x128xi32>
      %342 = arith.cmpi eq, %3, %341 : vector<1x1x128xi32>
      %343 = arith.index_cast %c1_i32_54 : i32 to index
      %344 = arith.index_cast %212 : i32 to index
      %c0_119 = arith.constant 0 : index
      %345 = vector.load %arg5[%343, %344, %c0_119] : memref<2x4x128xf32, #tpu.memory_space<vmem>>, vector<1x1x128xf32>
      tpu.vector_store %arg5[%343, %344, %c0_119], %4 masked %342 {strides = array<i32>} : memref<2x4x128xf32, #tpu.memory_space<vmem>>, vector<1x1x128xf32>, vector<1x1x128xi1>
    } else {
    }
    %c4_i32_73 = arith.constant 4 : i32
    %220 = arith.addi %175, %c4_i32_73 : i32
    %221 = arith.index_cast %220 : i32 to index
    %222 = memref.load %arg2[%221] : memref<60xi32, #tpu.memory_space<smem>>
    %223 = arith.subi %222, %0 : i32
    %224 = arith.index_cast %220 : i32 to index
    %225 = memref.load %arg3[%224] : memref<60xi32, #tpu.memory_space<smem>>
    %c0_i32_74 = arith.constant 0 : i32
    %226 = arith.cmpi sge, %223, %c0_i32_74 : i32
    %c4_i32_75 = arith.constant 4 : i32
    %227 = arith.cmpi slt, %223, %c4_i32_75 : i32
    %228 = arith.andi %226, %227 : i1
    %229 = arith.extui %228 : i1 to i32
    %c0_i32_76 = arith.constant 0 : i32
    %230 = arith.cmpi ne, %229, %c0_i32_76 : i32
    scf.if %230 {
      %341 = vector.broadcast %225 : i32 to vector<1x1x128xi32>
      %342 = arith.cmpi eq, %3, %341 : vector<1x1x128xi32>
      %343 = arith.index_cast %c1_i32_54 : i32 to index
      %344 = arith.index_cast %223 : i32 to index
      %c0_119 = arith.constant 0 : index
      %345 = vector.load %arg5[%343, %344, %c0_119] : memref<2x4x128xf32, #tpu.memory_space<vmem>>, vector<1x1x128xf32>
      tpu.vector_store %arg5[%343, %344, %c0_119], %4 masked %342 {strides = array<i32>} : memref<2x4x128xf32, #tpu.memory_space<vmem>>, vector<1x1x128xf32>, vector<1x1x128xi1>
    } else {
    }
    %c5_i32_77 = arith.constant 5 : i32
    %231 = arith.addi %175, %c5_i32_77 : i32
    %232 = arith.index_cast %231 : i32 to index
    %233 = memref.load %arg2[%232] : memref<60xi32, #tpu.memory_space<smem>>
    %234 = arith.subi %233, %0 : i32
    %235 = arith.index_cast %231 : i32 to index
    %236 = memref.load %arg3[%235] : memref<60xi32, #tpu.memory_space<smem>>
    %c0_i32_78 = arith.constant 0 : i32
    %237 = arith.cmpi sge, %234, %c0_i32_78 : i32
    %c4_i32_79 = arith.constant 4 : i32
    %238 = arith.cmpi slt, %234, %c4_i32_79 : i32
    %239 = arith.andi %237, %238 : i1
    %240 = arith.extui %239 : i1 to i32
    %c0_i32_80 = arith.constant 0 : i32
    %241 = arith.cmpi ne, %240, %c0_i32_80 : i32
    scf.if %241 {
      %341 = vector.broadcast %236 : i32 to vector<1x1x128xi32>
      %342 = arith.cmpi eq, %3, %341 : vector<1x1x128xi32>
      %343 = arith.index_cast %c1_i32_54 : i32 to index
      %344 = arith.index_cast %234 : i32 to index
      %c0_119 = arith.constant 0 : index
      %345 = vector.load %arg5[%343, %344, %c0_119] : memref<2x4x128xf32, #tpu.memory_space<vmem>>, vector<1x1x128xf32>
      tpu.vector_store %arg5[%343, %344, %c0_119], %4 masked %342 {strides = array<i32>} : memref<2x4x128xf32, #tpu.memory_space<vmem>>, vector<1x1x128xf32>, vector<1x1x128xi1>
    } else {
    }
    %c6_i32_81 = arith.constant 6 : i32
    %242 = arith.addi %175, %c6_i32_81 : i32
    %243 = arith.index_cast %242 : i32 to index
    %244 = memref.load %arg2[%243] : memref<60xi32, #tpu.memory_space<smem>>
    %245 = arith.subi %244, %0 : i32
    %246 = arith.index_cast %242 : i32 to index
    %247 = memref.load %arg3[%246] : memref<60xi32, #tpu.memory_space<smem>>
    %c0_i32_82 = arith.constant 0 : i32
    %248 = arith.cmpi sge, %245, %c0_i32_82 : i32
    %c4_i32_83 = arith.constant 4 : i32
    %249 = arith.cmpi slt, %245, %c4_i32_83 : i32
    %250 = arith.andi %248, %249 : i1
    %251 = arith.extui %250 : i1 to i32
    %c0_i32_84 = arith.constant 0 : i32
    %252 = arith.cmpi ne, %251, %c0_i32_84 : i32
    scf.if %252 {
      %341 = vector.broadcast %247 : i32 to vector<1x1x128xi32>
      %342 = arith.cmpi eq, %3, %341 : vector<1x1x128xi32>
      %343 = arith.index_cast %c1_i32_54 : i32 to index
      %344 = arith.index_cast %245 : i32 to index
      %c0_119 = arith.constant 0 : index
      %345 = vector.load %arg5[%343, %344, %c0_119] : memref<2x4x128xf32, #tpu.memory_space<vmem>>, vector<1x1x128xf32>
      tpu.vector_store %arg5[%343, %344, %c0_119], %4 masked %342 {strides = array<i32>} : memref<2x4x128xf32, #tpu.memory_space<vmem>>, vector<1x1x128xf32>, vector<1x1x128xi1>
    } else {
    }
    %c7_i32_85 = arith.constant 7 : i32
    %253 = arith.addi %175, %c7_i32_85 : i32
    %254 = arith.index_cast %253 : i32 to index
    %255 = memref.load %arg2[%254] : memref<60xi32, #tpu.memory_space<smem>>
    %256 = arith.subi %255, %0 : i32
    %257 = arith.index_cast %253 : i32 to index
    %258 = memref.load %arg3[%257] : memref<60xi32, #tpu.memory_space<smem>>
    %c0_i32_86 = arith.constant 0 : i32
    %259 = arith.cmpi sge, %256, %c0_i32_86 : i32
    %c4_i32_87 = arith.constant 4 : i32
    %260 = arith.cmpi slt, %256, %c4_i32_87 : i32
    %261 = arith.andi %259, %260 : i1
    %262 = arith.extui %261 : i1 to i32
    %c0_i32_88 = arith.constant 0 : i32
    %263 = arith.cmpi ne, %262, %c0_i32_88 : i32
    scf.if %263 {
      %341 = vector.broadcast %258 : i32 to vector<1x1x128xi32>
      %342 = arith.cmpi eq, %3, %341 : vector<1x1x128xi32>
      %343 = arith.index_cast %c1_i32_54 : i32 to index
      %344 = arith.index_cast %256 : i32 to index
      %c0_119 = arith.constant 0 : index
      %345 = vector.load %arg5[%343, %344, %c0_119] : memref<2x4x128xf32, #tpu.memory_space<vmem>>, vector<1x1x128xf32>
      tpu.vector_store %arg5[%343, %344, %c0_119], %4 masked %342 {strides = array<i32>} : memref<2x4x128xf32, #tpu.memory_space<vmem>>, vector<1x1x128xf32>, vector<1x1x128xi1>
    } else {
    }
    %c8_i32_89 = arith.constant 8 : i32
    %264 = arith.addi %175, %c8_i32_89 : i32
    %265 = arith.index_cast %264 : i32 to index
    %266 = memref.load %arg2[%265] : memref<60xi32, #tpu.memory_space<smem>>
    %267 = arith.subi %266, %0 : i32
    %268 = arith.index_cast %264 : i32 to index
    %269 = memref.load %arg3[%268] : memref<60xi32, #tpu.memory_space<smem>>
    %c0_i32_90 = arith.constant 0 : i32
    %270 = arith.cmpi sge, %267, %c0_i32_90 : i32
    %c4_i32_91 = arith.constant 4 : i32
    %271 = arith.cmpi slt, %267, %c4_i32_91 : i32
    %272 = arith.andi %270, %271 : i1
    %273 = arith.extui %272 : i1 to i32
    %c0_i32_92 = arith.constant 0 : i32
    %274 = arith.cmpi ne, %273, %c0_i32_92 : i32
    scf.if %274 {
      %341 = vector.broadcast %269 : i32 to vector<1x1x128xi32>
      %342 = arith.cmpi eq, %3, %341 : vector<1x1x128xi32>
      %343 = arith.index_cast %c1_i32_54 : i32 to index
      %344 = arith.index_cast %267 : i32 to index
      %c0_119 = arith.constant 0 : index
      %345 = vector.load %arg5[%343, %344, %c0_119] : memref<2x4x128xf32, #tpu.memory_space<vmem>>, vector<1x1x128xf32>
      tpu.vector_store %arg5[%343, %344, %c0_119], %4 masked %342 {strides = array<i32>} : memref<2x4x128xf32, #tpu.memory_space<vmem>>, vector<1x1x128xf32>, vector<1x1x128xi1>
    } else {
    }
    %c9_i32_93 = arith.constant 9 : i32
    %275 = arith.addi %175, %c9_i32_93 : i32
    %276 = arith.index_cast %275 : i32 to index
    %277 = memref.load %arg2[%276] : memref<60xi32, #tpu.memory_space<smem>>
    %278 = arith.subi %277, %0 : i32
    %279 = arith.index_cast %275 : i32 to index
    %280 = memref.load %arg3[%279] : memref<60xi32, #tpu.memory_space<smem>>
    %c0_i32_94 = arith.constant 0 : i32
    %281 = arith.cmpi sge, %278, %c0_i32_94 : i32
    %c4_i32_95 = arith.constant 4 : i32
    %282 = arith.cmpi slt, %278, %c4_i32_95 : i32
    %283 = arith.andi %281, %282 : i1
    %284 = arith.extui %283 : i1 to i32
    %c0_i32_96 = arith.constant 0 : i32
    %285 = arith.cmpi ne, %284, %c0_i32_96 : i32
    scf.if %285 {
      %341 = vector.broadcast %280 : i32 to vector<1x1x128xi32>
      %342 = arith.cmpi eq, %3, %341 : vector<1x1x128xi32>
      %343 = arith.index_cast %c1_i32_54 : i32 to index
      %344 = arith.index_cast %278 : i32 to index
      %c0_119 = arith.constant 0 : index
      %345 = vector.load %arg5[%343, %344, %c0_119] : memref<2x4x128xf32, #tpu.memory_space<vmem>>, vector<1x1x128xf32>
      tpu.vector_store %arg5[%343, %344, %c0_119], %4 masked %342 {strides = array<i32>} : memref<2x4x128xf32, #tpu.memory_space<vmem>>, vector<1x1x128xf32>, vector<1x1x128xi1>
    } else {
    }
    %c10_i32_97 = arith.constant 10 : i32
    %286 = arith.addi %175, %c10_i32_97 : i32
    %287 = arith.index_cast %286 : i32 to index
    %288 = memref.load %arg2[%287] : memref<60xi32, #tpu.memory_space<smem>>
    %289 = arith.subi %288, %0 : i32
    %290 = arith.index_cast %286 : i32 to index
    %291 = memref.load %arg3[%290] : memref<60xi32, #tpu.memory_space<smem>>
    %c0_i32_98 = arith.constant 0 : i32
    %292 = arith.cmpi sge, %289, %c0_i32_98 : i32
    %c4_i32_99 = arith.constant 4 : i32
    %293 = arith.cmpi slt, %289, %c4_i32_99 : i32
    %294 = arith.andi %292, %293 : i1
    %295 = arith.extui %294 : i1 to i32
    %c0_i32_100 = arith.constant 0 : i32
    %296 = arith.cmpi ne, %295, %c0_i32_100 : i32
    scf.if %296 {
      %341 = vector.broadcast %291 : i32 to vector<1x1x128xi32>
      %342 = arith.cmpi eq, %3, %341 : vector<1x1x128xi32>
      %343 = arith.index_cast %c1_i32_54 : i32 to index
      %344 = arith.index_cast %289 : i32 to index
      %c0_119 = arith.constant 0 : index
      %345 = vector.load %arg5[%343, %344, %c0_119] : memref<2x4x128xf32, #tpu.memory_space<vmem>>, vector<1x1x128xf32>
      tpu.vector_store %arg5[%343, %344, %c0_119], %4 masked %342 {strides = array<i32>} : memref<2x4x128xf32, #tpu.memory_space<vmem>>, vector<1x1x128xf32>, vector<1x1x128xi1>
    } else {
    }
    %c11_i32_101 = arith.constant 11 : i32
    %297 = arith.addi %175, %c11_i32_101 : i32
    %298 = arith.index_cast %297 : i32 to index
    %299 = memref.load %arg2[%298] : memref<60xi32, #tpu.memory_space<smem>>
    %300 = arith.subi %299, %0 : i32
    %301 = arith.index_cast %297 : i32 to index
    %302 = memref.load %arg3[%301] : memref<60xi32, #tpu.memory_space<smem>>
    %c0_i32_102 = arith.constant 0 : i32
    %303 = arith.cmpi sge, %300, %c0_i32_102 : i32
    %c4_i32_103 = arith.constant 4 : i32
    %304 = arith.cmpi slt, %300, %c4_i32_103 : i32
    %305 = arith.andi %303, %304 : i1
    %306 = arith.extui %305 : i1 to i32
    %c0_i32_104 = arith.constant 0 : i32
    %307 = arith.cmpi ne, %306, %c0_i32_104 : i32
    scf.if %307 {
      %341 = vector.broadcast %302 : i32 to vector<1x1x128xi32>
      %342 = arith.cmpi eq, %3, %341 : vector<1x1x128xi32>
      %343 = arith.index_cast %c1_i32_54 : i32 to index
      %344 = arith.index_cast %300 : i32 to index
      %c0_119 = arith.constant 0 : index
      %345 = vector.load %arg5[%343, %344, %c0_119] : memref<2x4x128xf32, #tpu.memory_space<vmem>>, vector<1x1x128xf32>
      tpu.vector_store %arg5[%343, %344, %c0_119], %4 masked %342 {strides = array<i32>} : memref<2x4x128xf32, #tpu.memory_space<vmem>>, vector<1x1x128xf32>, vector<1x1x128xi1>
    } else {
    }
    %c12_i32_105 = arith.constant 12 : i32
    %308 = arith.addi %175, %c12_i32_105 : i32
    %309 = arith.index_cast %308 : i32 to index
    %310 = memref.load %arg2[%309] : memref<60xi32, #tpu.memory_space<smem>>
    %311 = arith.subi %310, %0 : i32
    %312 = arith.index_cast %308 : i32 to index
    %313 = memref.load %arg3[%312] : memref<60xi32, #tpu.memory_space<smem>>
    %c0_i32_106 = arith.constant 0 : i32
    %314 = arith.cmpi sge, %311, %c0_i32_106 : i32
    %c4_i32_107 = arith.constant 4 : i32
    %315 = arith.cmpi slt, %311, %c4_i32_107 : i32
    %316 = arith.andi %314, %315 : i1
    %317 = arith.extui %316 : i1 to i32
    %c0_i32_108 = arith.constant 0 : i32
    %318 = arith.cmpi ne, %317, %c0_i32_108 : i32
    scf.if %318 {
      %341 = vector.broadcast %313 : i32 to vector<1x1x128xi32>
      %342 = arith.cmpi eq, %3, %341 : vector<1x1x128xi32>
      %343 = arith.index_cast %c1_i32_54 : i32 to index
      %344 = arith.index_cast %311 : i32 to index
      %c0_119 = arith.constant 0 : index
      %345 = vector.load %arg5[%343, %344, %c0_119] : memref<2x4x128xf32, #tpu.memory_space<vmem>>, vector<1x1x128xf32>
      tpu.vector_store %arg5[%343, %344, %c0_119], %4 masked %342 {strides = array<i32>} : memref<2x4x128xf32, #tpu.memory_space<vmem>>, vector<1x1x128xf32>, vector<1x1x128xi1>
    } else {
    }
    %c13_i32_109 = arith.constant 13 : i32
    %319 = arith.addi %175, %c13_i32_109 : i32
    %320 = arith.index_cast %319 : i32 to index
    %321 = memref.load %arg2[%320] : memref<60xi32, #tpu.memory_space<smem>>
    %322 = arith.subi %321, %0 : i32
    %323 = arith.index_cast %319 : i32 to index
    %324 = memref.load %arg3[%323] : memref<60xi32, #tpu.memory_space<smem>>
    %c0_i32_110 = arith.constant 0 : i32
    %325 = arith.cmpi sge, %322, %c0_i32_110 : i32
    %c4_i32_111 = arith.constant 4 : i32
    %326 = arith.cmpi slt, %322, %c4_i32_111 : i32
    %327 = arith.andi %325, %326 : i1
    %328 = arith.extui %327 : i1 to i32
    %c0_i32_112 = arith.constant 0 : i32
    %329 = arith.cmpi ne, %328, %c0_i32_112 : i32
    scf.if %329 {
      %341 = vector.broadcast %324 : i32 to vector<1x1x128xi32>
      %342 = arith.cmpi eq, %3, %341 : vector<1x1x128xi32>
      %343 = arith.index_cast %c1_i32_54 : i32 to index
      %344 = arith.index_cast %322 : i32 to index
      %c0_119 = arith.constant 0 : index
      %345 = vector.load %arg5[%343, %344, %c0_119] : memref<2x4x128xf32, #tpu.memory_space<vmem>>, vector<1x1x128xf32>
      tpu.vector_store %arg5[%343, %344, %c0_119], %4 masked %342 {strides = array<i32>} : memref<2x4x128xf32, #tpu.memory_space<vmem>>, vector<1x1x128xf32>, vector<1x1x128xi1>
    } else {
    }
    %c14_i32_113 = arith.constant 14 : i32
    %330 = arith.addi %175, %c14_i32_113 : i32
    %331 = arith.index_cast %330 : i32 to index
    %332 = memref.load %arg2[%331] : memref<60xi32, #tpu.memory_space<smem>>
    %333 = arith.subi %332, %0 : i32
    %334 = arith.index_cast %330 : i32 to index
    %335 = memref.load %arg3[%334] : memref<60xi32, #tpu.memory_space<smem>>
    %c0_i32_114 = arith.constant 0 : i32
    %336 = arith.cmpi sge, %333, %c0_i32_114 : i32
    %c4_i32_115 = arith.constant 4 : i32
    %337 = arith.cmpi slt, %333, %c4_i32_115 : i32
    %338 = arith.andi %336, %337 : i1
    %339 = arith.extui %338 : i1 to i32
    %c0_i32_116 = arith.constant 0 : i32
    %340 = arith.cmpi ne, %339, %c0_i32_116 : i32
    scf.if %340 {
      %341 = vector.broadcast %335 : i32 to vector<1x1x128xi32>
      %342 = arith.cmpi eq, %3, %341 : vector<1x1x128xi32>
      %343 = arith.index_cast %c1_i32_54 : i32 to index
      %344 = arith.index_cast %333 : i32 to index
      %c0_119 = arith.constant 0 : index
      %345 = vector.load %arg5[%343, %344, %c0_119] : memref<2x4x128xf32, #tpu.memory_space<vmem>>, vector<1x1x128xf32>
      tpu.vector_store %arg5[%343, %344, %c0_119], %4 masked %342 {strides = array<i32>} : memref<2x4x128xf32, #tpu.memory_space<vmem>>, vector<1x1x128xf32>, vector<1x1x128xi1>
    } else {
    }
    %c15_i32_117 = arith.constant 15 : i32
    %c2_i32_118 = arith.constant 2 : i32
    return
  }
  func.func @transform_0(%arg0: i32, %arg1: i32, %arg2: memref<60xi32, #tpu.memory_space<smem>>, %arg3: memref<60xi32, #tpu.memory_space<smem>>) -> (i32, i32, i32) {
    %c0_i32 = arith.constant 0 : i32
    %c0_i32_0 = arith.constant 0 : i32
    return %arg0, %arg1, %c0_i32 : i32, i32, i32
  }
  func.func @transform_1(%arg0: i32, %arg1: i32, %arg2: memref<60xi32, #tpu.memory_space<smem>>, %arg3: memref<60xi32, #tpu.memory_space<smem>>) -> (i32, i32, i32) {
    %c0_i32 = arith.constant 0 : i32
    %c0_i32_0 = arith.constant 0 : i32
    return %arg0, %arg1, %c0_i32 : i32, i32, i32
  }
}

</mosaic_0001>

<bundles_post_ra>
// kernel: tpu_custom_call.1
= control target key start
LH: loop header
LB: loop body
LE: loop exit
PB: predicated region body
PF: predicated region fallthrough
CT: control target
= control target key end

     0   :  { %s1033_s18 = smov [#allocation3]   ;;  %s1034_s19 = smov [#allocation4]   ;;  %s1319_s0 = inlined_call_operand.hbm [shape: s32[60], index: 0, kind: input, shape index: {}]   ;;  %s1320_s2 = inlined_call_operand.hbm [shape: f32[4,4,128], index: 2, kind: input, shape index: {}]   ;;  %s1321_s3 = inlined_call_operand.hbm [shape: f32[4,4,128], index: 3, kind: output, shape index: {}]   ;;  %s1322_s1 = inlined_call_operand.hbm [shape: s32[60], index: 1, kind: input, shape index: {}]  }
   0x1   :  { %s9_s14 = sshll.u32 %s1319_s0, 4  ;;  %s14_s17 = sshll.u32 %s1322_s1, 4  ;;  %s10_s14 = int_to_ptr.hbm [resolvable:$true] %s9_s14  ;;  %s15_s17 = int_to_ptr.hbm [resolvable:$true] %s14_s17 }
   0x2   :  { %12 = dma.hbm_to_smem %s10_s14, 16, %s1033_s18, [#allocation2] }
   0x3   :  { %17 = dma.hbm_to_smem %s15_s17, 16, %s1034_s19, [#allocation2] }
   0x4   :  { %999 = dma.done.wait [#allocation2], 32 }
   0x5   :  { %1000 = vsyncadd [#allocation2], 4294967264 }
   0x6   :  { %20 = sfence }
   0x7   :  { %21 = vsyncpa [#allocation6], 0 }
   0x8   :  { %23 = vsyncpa [#allocation6 + $0x1], 0 }
   0x9   :  { %24 = vsyncpa [#allocation7], 0 }
   0xa   :  { %26 = vsyncpa [#allocation7 + $0x1], 0  ;;  %s1095_s20 = smov 0   ;;  %s1097_s0 = smov 0  }
   0xb   :  { %s1099_s21 = smov 0   ;;  %s1101_s1 = smov 0  }
   0xc   :  { %s1103_s22 = smov 0   ;;  %s1105_s23 = smov 0  }
   0xd LB: > { %s762_s24 = sadd.s32 4294967295, %s1031_s23   ;;  %s763_s25 = sadd.s32 4294967294, %s1031_s23   ;;  %s1031_s23 = sphi %s1105_s23, %s32_s23   ;;  %s1027_s22 = sphi %s1103_s22, %s1331_s22   ;;  %s1023_s1 = sphi %s1101_s1, %s1330_s1   ;;  %s1019_s21 = sphi %s1099_s21, %s1329_s21   ;;  %s1015_s0 = sphi %s1097_s0, %s1328_s0   ;;  %s1011_s20 = sphi %s1095_s20, %s1327_s20  }
   0xe   : > { %s44_s26 = sadd.s32 1, %s1027_s22  ;;  %s53_s27 = sadd.s32 1, %s1019_s21 }
   0xf   : > { %p46_p0 = scmp.ge.s32.totalorder %s44_s26, 2  ;;  %p60_p1 = scmp.ne.s32.totalorder %s1019_s21, %s1015_s0 }
  0x10   : > { %p61_p2 = scmp.eq.s32.totalorder %s1031_s23, 0  ;;  %p66_p3 = scmp.ne.s32.totalorder %s1015_s0, %s1011_s20 }
  0x11   : > { %s1333_s26 = smov (%p46_p0, %s44_s26), 0  ;;  %p67_p5 = scmp.eq.s32.totalorder %s762_s24, 0 }
  0x12   : > { %p1136_p4 = por %p61_p2, %p60_p1  ;;  %s48_s29 = ssub.s32 %s1027_s22, %s1333_s26 }
  0x13   : > { %p92_p6 = scmp.eq.s32.totalorder %s762_s24, 1  ;;  %p51_p7 = scmp.eq.s32.totalorder %s48_s29, 0 }
  0x14   : > { %p1142_p8 = por %p67_p5, %p66_p3  ;;  %p98_p10 = scmp.eq.s32.totalorder %s763_s25, 1 }
  0x15   : > { %p1146_p9 = por %p92_p6, %p60_p1  ;;  %p765_p12 = scmp.ge.s32.totalorder %s1031_s23, 2 }
  0x16   : > { %s1151_s5 = scalar_select %p51_p7, %s1019_s21, %s53_s27  }
  0x17   : > { %p1153_p11 = por %p98_p10, %p66_p3  ;;  %p807_p13 = scmp.lt.s32.totalorder %s1031_s23, 2 }
  0x18   : > { %s118_s7 = sand.u32 1, %s1019_s21   ;;  %s793_s9 = sshll.u32 %s1027_s22, 3 }
  0x19   : > { %s766_s8 = sshll.u32 %s118_s7, 3  ;;  %s128_s12 = scalar_lea.hbm %s1320_s2, %s793_s9 }
  0x1a   : > { %s122_s13 = scalar_lea.vmem [#allocation5], %s766_s8  ;;  %s129_s15 = sshll.u32 %s128_s12, 4  ;;  %s130_s15 = int_to_ptr.hbm [resolvable:$true] %s129_s15 }
  0x1b   : > { %s131_s14 = sshll.u32 %s122_s13, 4  ;;  %p800_p0 = pnand %p807_p13, %p1136_p4  ;;  %s132_s14 = int_to_ptr.vmem [resolvable:$true] %s131_s14 }
  0x1c   : > { %p769_p1 = scmp.ge.s32.totalorder %s1031_s23, 1  ;;  %s119_s16 = scalar_lea.sflag [#allocation6], %s118_s7 }
  0x1d   : > { %s1035_s17 = smov 64   ;;  %s1036_s18 = smov 4  }
  0x1e   : > { %802 = dma.hbm_to_vmem [thread:$0]  (!%p800_p0), %s130_s15, 128, %s132_s14, %s119_s16, %s1035_s17, %s1035_s17, %s1036_s18  }
  0x1f   : > { %p139_p2 = scmp.lt.s32.totalorder %s1031_s23, 3 }
  0x21   : > { %p140_p3 = pnand %p769_p1, %p139_p2 }
  0x22   : > { %s1169_s19 = sand.u32 (!%p140_p3), 1, %s1015_s0  }
  0x23   : > { %143 = sbr.rel (%p140_p3) target bundleno = 631 (0x277), region = 24  ;;  %s770_s24 = sshll.u32 (!%p140_p3), %s1169_s19, 3 }
  0x24   : > { %s146_s25 = scalar_lea.sflag (!%p140_p3), [#allocation6], %s1169_s19  ;;  %s149_s27 = scalar_lea.vmem (!%p140_p3), [#allocation5], %s770_s24 }
  0x28   : > { %1002 = dma.done.wait (%p1142_p8), %s146_s25, 128  }
  0x29   : > { %1004 = vsyncadd (%p1142_p8), %s146_s25, 4294967168  ;;  %s1178_s28 = smul.u32 30, %s1023_s1  ;;  %v176_v0 = vlaneseq  ;;  %v172_v2 = vld [vmem:[%s149_s27] sm:$0xff]   ;;  %s1184_s8 = scalar_lea.vmem [#allocation8], %s770_s24 }
  0x2a   : > { %174 = vst [vmem:[%s1184_s8] sm:$0xff] %v172_v2  }
  0x2b   : > { %s179_s29 = sld [smem:[#allocation3 + %s1178_s28]]  ;;  %v1181_v1 = vand.u32 127, %v176_v0 }
  0x2c   : > { %s181_s7 = sld [smem:[#allocation4 + %s1178_s28]] }
  0x31   : > { %p182_p4 = scmp.ge.s32.totalorder %s179_s29, 0  ;;  %p183_p5 = scmp.lt.s32.totalorder %s179_s29, 4 }
  0x33   : > { %p184_p6 = pnand %p183_p5, %p182_p4 }
  0x34   : > { %s190_s30 = scalar_lea.vmem (!%p184_p6), %s1184_s8, %s179_s29 [#allocation8] }
  0x35   : > { %187 = sbr.rel (%p184_p6) target bundleno = 61 (0x3d), region = 32 }
  0x3a   : > { %v188_v3 = vstv %s181_s7  ;;  %v1037_v4 = vmov 0.0  }
  0x3b   : > { %vm189_vm0 = vcmp.eq.s32.totalorder %v1181_v1, %v188_v3 }
  0x3c   : > { %191 = vst.msk [vmem:[%s190_s30] sm:$0x1] %vm189_vm0, %v1037_v4 }
  0x3d PF: > { %s192_s9 = sadd.s32 1, %s1178_s28 }
  0x3e   : > { %s193_s10 = sld [smem:[#allocation3 + %s192_s9]] }
  0x3f   : > { %s195_s11 = sld [smem:[#allocation4 + %s192_s9]] }
  0x44   : > { %p196_p7 = scmp.ge.s32.totalorder %s193_s10, 0  ;;  %p197_p8 = scmp.lt.s32.totalorder %s193_s10, 4 }
  0x46   : > { %p198_p10 = pnand %p197_p8, %p196_p7 }
  0x47   : > { %s204_s12 = scalar_lea.vmem (!%p198_p10), %s1184_s8, %s193_s10 [#allocation8] }
  0x48   : > { %201 = sbr.rel (%p198_p10) target bundleno = 80 (0x50), region = 36 }
  0x4d   : > { %v202_v5 = vstv %s195_s11  ;;  %v1038_v6 = vmov 0.0  }
  0x4e   : > { %vm203_vm1 = vcmp.eq.s32.totalorder %v1181_v1, %v202_v5 }
  0x4f   : > { %205 = vst.msk [vmem:[%s204_s12] sm:$0x1] %vm203_vm1, %v1038_v6 }
  0x50 PF: > { %s206_s13 = sadd.s32 2, %s1178_s28 }
  0x51   : > { %s207_s14 = sld [smem:[#allocation3 + %s206_s13]] }
  0x52   : > { %s209_s15 = sld [smem:[#allocation4 + %s206_s13]] }
  0x57   : > { %p210_p13 = scmp.ge.s32.totalorder %s207_s14, 0  ;;  %p211_p0 = scmp.lt.s32.totalorder %s207_s14, 4 }
  0x59   : > { %p212_p1 = pnand %p211_p0, %p210_p13 }
  0x5a   : > { %s218_s16 = scalar_lea.vmem (!%p212_p1), %s1184_s8, %s207_s14 [#allocation8] }
  0x5b   : > { %215 = sbr.rel (%p212_p1) target bundleno = 99 (0x63), region = 40 }
  0x60   : > { %v216_v7 = vstv %s209_s15  ;;  %v1039_v8 = vmov 0.0  }
  0x61   : > { %vm217_vm2 = vcmp.eq.s32.totalorder %v1181_v1, %v216_v7 }
  0x62   : > { %219 = vst.msk [vmem:[%s218_s16] sm:$0x1] %vm217_vm2, %v1039_v8 }
  0x63 PF: > { %s220_s17 = sadd.s32 3, %s1178_s28 }
  0x64   : > { %s221_s18 = sld [smem:[#allocation3 + %s220_s17]] }
  0x65   : > { %s223_s24 = sld [smem:[#allocation4 + %s220_s17]] }
  0x6a   : > { %p224_p2 = scmp.ge.s32.totalorder %s221_s18, 0  ;;  %p225_p3 = scmp.lt.s32.totalorder %s221_s18, 4 }
  0x6c   : > { %p226_p4 = pnand %p225_p3, %p224_p2 }
  0x6d   : > { %s232_s25 = scalar_lea.vmem (!%p226_p4), %s1184_s8, %s221_s18 [#allocation8] }
  0x6e   : > { %229 = sbr.rel (%p226_p4) target bundleno = 118 (0x76), region = 44 }
  0x73   : > { %v230_v9 = vstv %s223_s24  ;;  %v1040_v10 = vmov 0.0  }
  0x74   : > { %vm231_vm3 = vcmp.eq.s32.totalorder %v1181_v1, %v230_v9 }
  0x75   : > { %233 = vst.msk [vmem:[%s232_s25] sm:$0x1] %vm231_vm3, %v1040_v10 }
  0x76 PF: > { %s234_s27 = sadd.s32 4, %s1178_s28 }
  0x77   : > { %s235_s29 = sld [smem:[#allocation3 + %s234_s27]] }
  0x78   : > { %s237_s7 = sld [smem:[#allocation4 + %s234_s27]] }
  0x7d   : > { %p238_p5 = scmp.ge.s32.totalorder %s235_s29, 0  ;;  %p239_p6 = scmp.lt.s32.totalorder %s235_s29, 4 }
  0x7f   : > { %p240_p7 = pnand %p239_p6, %p238_p5 }
  0x80   : > { %s246_s30 = scalar_lea.vmem (!%p240_p7), %s1184_s8, %s235_s29 [#allocation8] }
  0x81   : > { %243 = sbr.rel (%p240_p7) target bundleno = 137 (0x89), region = 48 }
  0x86   : > { %v244_v11 = vstv %s237_s7  ;;  %v1041_v12 = vmov 0.0  }
  0x87   : > { %vm245_vm4 = vcmp.eq.s32.totalorder %v1181_v1, %v244_v11 }
  0x88   : > { %247 = vst.msk [vmem:[%s246_s30] sm:$0x1] %vm245_vm4, %v1041_v12 }
  0x89 PF: > { %s248_s9 = sadd.s32 5, %s1178_s28 }
  0x8a   : > { %s249_s10 = sld [smem:[#allocation3 + %s248_s9]] }
  0x8b   : > { %s251_s11 = sld [smem:[#allocation4 + %s248_s9]] }
  0x90   : > { %p252_p8 = scmp.ge.s32.totalorder %s249_s10, 0  ;;  %p253_p10 = scmp.lt.s32.totalorder %s249_s10, 4 }
  0x92   : > { %p254_p13 = pnand %p253_p10, %p252_p8 }
  0x93   : > { %s260_s12 = scalar_lea.vmem (!%p254_p13), %s1184_s8, %s249_s10 [#allocation8] }
  0x94   : > { %257 = sbr.rel (%p254_p13) target bundleno = 156 (0x9c), region = 52 }
  0x99   : > { %v258_v13 = vstv %s251_s11  ;;  %v1042_v14 = vmov 0.0  }
  0x9a   : > { %vm259_vm5 = vcmp.eq.s32.totalorder %v1181_v1, %v258_v13 }
  0x9b   : > { %261 = vst.msk [vmem:[%s260_s12] sm:$0x1] %vm259_vm5, %v1042_v14 }
  0x9c PF: > { %s262_s13 = sadd.s32 6, %s1178_s28 }
  0x9d   : > { %s263_s14 = sld [smem:[#allocation3 + %s262_s13]] }
  0x9e   : > { %s265_s15 = sld [smem:[#allocation4 + %s262_s13]] }
  0xa3   : > { %p266_p0 = scmp.ge.s32.totalorder %s263_s14, 0  ;;  %p267_p1 = scmp.lt.s32.totalorder %s263_s14, 4 }
  0xa5   : > { %p268_p2 = pnand %p267_p1, %p266_p0 }
  0xa6   : > { %s274_s16 = scalar_lea.vmem (!%p268_p2), %s1184_s8, %s263_s14 [#allocation8] }
  0xa7   : > { %271 = sbr.rel (%p268_p2) target bundleno = 175 (0xaf), region = 56 }
  0xac   : > { %v272_v15 = vstv %s265_s15  ;;  %v1043_v16 = vmov 0.0  }
  0xad   : > { %vm273_vm6 = vcmp.eq.s32.totalorder %v1181_v1, %v272_v15 }
  0xae   : > { %275 = vst.msk [vmem:[%s274_s16] sm:$0x1] %vm273_vm6, %v1043_v16 }
  0xaf PF: > { %s276_s17 = sadd.s32 7, %s1178_s28 }
  0xb0   : > { %s277_s18 = sld [smem:[#allocation3 + %s276_s17]] }
  0xb1   : > { %s279_s24 = sld [smem:[#allocation4 + %s276_s17]] }
  0xb6   : > { %p280_p3 = scmp.ge.s32.totalorder %s277_s18, 0  ;;  %p281_p4 = scmp.lt.s32.totalorder %s277_s18, 4 }
  0xb8   : > { %p282_p5 = pnand %p281_p4, %p280_p3 }
  0xb9   : > { %s288_s25 = scalar_lea.vmem (!%p282_p5), %s1184_s8, %s277_s18 [#allocation8] }
  0xba   : > { %285 = sbr.rel (%p282_p5) target bundleno = 194 (0xc2), region = 60 }
  0xbf   : > { %v286_v17 = vstv %s279_s24  ;;  %v1044_v18 = vmov 0.0  }
  0xc0   : > { %vm287_vm7 = vcmp.eq.s32.totalorder %v1181_v1, %v286_v17 }
  0xc1   : > { %289 = vst.msk [vmem:[%s288_s25] sm:$0x1] %vm287_vm7, %v1044_v18 }
  0xc2 PF: > { %s290_s27 = sadd.s32 8, %s1178_s28 }
  0xc3   : > { %s291_s29 = sld [smem:[#allocation3 + %s290_s27]] }
  0xc4   : > { %s293_s7 = sld [smem:[#allocation4 + %s290_s27]] }
  0xc9   : > { %p294_p6 = scmp.ge.s32.totalorder %s291_s29, 0  ;;  %p295_p7 = scmp.lt.s32.totalorder %s291_s29, 4 }
  0xcb   : > { %p296_p8 = pnand %p295_p7, %p294_p6 }
  0xcc   : > { %s302_s30 = scalar_lea.vmem (!%p296_p8), %s1184_s8, %s291_s29 [#allocation8] }
  0xcd   : > { %299 = sbr.rel (%p296_p8) target bundleno = 213 (0xd5), region = 64 }
  0xd2   : > { %v300_v19 = vstv %s293_s7  ;;  %v1045_v20 = vmov 0.0  }
  0xd3   : > { %vm301_vm8 = vcmp.eq.s32.totalorder %v1181_v1, %v300_v19 }
  0xd4   : > { %303 = vst.msk [vmem:[%s302_s30] sm:$0x1] %vm301_vm8, %v1045_v20 }
  0xd5 PF: > { %s304_s9 = sadd.s32 9, %s1178_s28 }
  0xd6   : > { %s305_s10 = sld [smem:[#allocation3 + %s304_s9]] }
  0xd7   : > { %s307_s11 = sld [smem:[#allocation4 + %s304_s9]] }
  0xdc   : > { %p308_p10 = scmp.ge.s32.totalorder %s305_s10, 0  ;;  %p309_p13 = scmp.lt.s32.totalorder %s305_s10, 4 }
  0xde   : > { %p310_p0 = pnand %p309_p13, %p308_p10 }
  0xdf   : > { %s316_s12 = scalar_lea.vmem (!%p310_p0), %s1184_s8, %s305_s10 [#allocation8] }
  0xe0   : > { %313 = sbr.rel (%p310_p0) target bundleno = 232 (0xe8), region = 68 }
  0xe5   : > { %v314_v21 = vstv %s307_s11  ;;  %v1046_v22 = vmov 0.0  }
  0xe6   : > { %vm315_vm9 = vcmp.eq.s32.totalorder %v1181_v1, %v314_v21 }
  0xe7   : > { %317 = vst.msk [vmem:[%s316_s12] sm:$0x1] %vm315_vm9, %v1046_v22 }
  0xe8 PF: > { %s318_s13 = sadd.s32 10, %s1178_s28 }
  0xe9   : > { %s319_s14 = sld [smem:[#allocation3 + %s318_s13]] }
  0xea   : > { %s321_s15 = sld [smem:[#allocation4 + %s318_s13]] }
  0xef   : > { %p322_p1 = scmp.ge.s32.totalorder %s319_s14, 0  ;;  %p323_p2 = scmp.lt.s32.totalorder %s319_s14, 4 }
  0xf1   : > { %p324_p3 = pnand %p323_p2, %p322_p1 }
  0xf2   : > { %s330_s16 = scalar_lea.vmem (!%p324_p3), %s1184_s8, %s319_s14 [#allocation8] }
  0xf3   : > { %327 = sbr.rel (%p324_p3) target bundleno = 251 (0xfb), region = 72 }
  0xf8   : > { %v328_v23 = vstv %s321_s15  ;;  %v1047_v24 = vmov 0.0  }
  0xf9   : > { %vm329_vm10 = vcmp.eq.s32.totalorder %v1181_v1, %v328_v23 }
  0xfa   : > { %331 = vst.msk [vmem:[%s330_s16] sm:$0x1] %vm329_vm10, %v1047_v24 }
  0xfb PF: > { %s332_s17 = sadd.s32 11, %s1178_s28 }
  0xfc   : > { %s333_s18 = sld [smem:[#allocation3 + %s332_s17]] }
  0xfd   : > { %s335_s24 = sld [smem:[#allocation4 + %s332_s17]] }
 0x102   : > { %p336_p4 = scmp.ge.s32.totalorder %s333_s18, 0  ;;  %p337_p5 = scmp.lt.s32.totalorder %s333_s18, 4 }
 0x104   : > { %p338_p6 = pnand %p337_p5, %p336_p4 }
 0x105   : > { %s344_s25 = scalar_lea.vmem (!%p338_p6), %s1184_s8, %s333_s18 [#allocation8] }
 0x106   : > { %341 = sbr.rel (%p338_p6) target bundleno = 270 (0x10e), region = 76 }
 0x10b   : > { %v342_v25 = vstv %s335_s24  ;;  %v1048_v26 = vmov 0.0  }
 0x10c   : > { %vm343_vm11 = vcmp.eq.s32.totalorder %v1181_v1, %v342_v25 }
 0x10d   : > { %345 = vst.msk [vmem:[%s344_s25] sm:$0x1] %vm343_vm11, %v1048_v26 }
 0x10e PF: > { %s346_s27 = sadd.s32 12, %s1178_s28 }
 0x10f   : > { %s347_s29 = sld [smem:[#allocation3 + %s346_s27]] }
 0x110   : > { %s349_s7 = sld [smem:[#allocation4 + %s346_s27]] }
 0x115   : > { %p350_p7 = scmp.ge.s32.totalorder %s347_s29, 0  ;;  %p351_p8 = scmp.lt.s32.totalorder %s347_s29, 4 }
 0x117   : > { %p352_p10 = pnand %p351_p8, %p350_p7 }
 0x118   : > { %s358_s30 = scalar_lea.vmem (!%p352_p10), %s1184_s8, %s347_s29 [#allocation8] }
 0x119   : > { %355 = sbr.rel (%p352_p10) target bundleno = 289 (0x121), region = 80 }
 0x11e   : > { %v356_v27 = vstv %s349_s7  ;;  %v1049_v28 = vmov 0.0  }
 0x11f   : > { %vm357_vm12 = vcmp.eq.s32.totalorder %v1181_v1, %v356_v27 }
 0x120   : > { %359 = vst.msk [vmem:[%s358_s30] sm:$0x1] %vm357_vm12, %v1049_v28 }
 0x121 PF: > { %s360_s9 = sadd.s32 13, %s1178_s28 }
 0x122   : > { %s361_s10 = sld [smem:[#allocation3 + %s360_s9]] }
 0x123   : > { %s363_s11 = sld [smem:[#allocation4 + %s360_s9]] }
 0x128   : > { %p364_p13 = scmp.ge.s32.totalorder %s361_s10, 0  ;;  %p365_p0 = scmp.lt.s32.totalorder %s361_s10, 4 }
 0x12a   : > { %p366_p1 = pnand %p365_p0, %p364_p13 }
 0x12b   : > { %s372_s12 = scalar_lea.vmem (!%p366_p1), %s1184_s8, %s361_s10 [#allocation8] }
 0x12c   : > { %369 = sbr.rel (%p366_p1) target bundleno = 308 (0x134), region = 84 }
 0x131   : > { %v370_v29 = vstv %s363_s11  ;;  %v1050_v30 = vmov 0.0  }
 0x132   : > { %vm371_vm13 = vcmp.eq.s32.totalorder %v1181_v1, %v370_v29 }
 0x133   : > { %373 = vst.msk [vmem:[%s372_s12] sm:$0x1] %vm371_vm13, %v1050_v30 }
 0x134 PF: > { %s374_s13 = sadd.s32 14, %s1178_s28 }
 0x135   : > { %s375_s14 = sld [smem:[#allocation3 + %s374_s13]] }
 0x136   : > { %s377_s15 = sld [smem:[#allocation4 + %s374_s13]] }
 0x13b   : > { %p378_p2 = scmp.ge.s32.totalorder %s375_s14, 0  ;;  %p379_p3 = scmp.lt.s32.totalorder %s375_s14, 4 }
 0x13d   : > { %p380_p4 = pnand %p379_p3, %p378_p2 }
 0x13e   : > { %s386_s16 = scalar_lea.vmem (!%p380_p4), %s1184_s8, %s375_s14 [#allocation8] }
 0x13f   : > { %383 = sbr.rel (%p380_p4) target bundleno = 327 (0x147), region = 88 }
 0x144   : > { %v384_v31 = vstv %s377_s15  ;;  %v1051_v32 = vmov 0.0  }
 0x145   : > { %vm385_vm14 = vcmp.eq.s32.totalorder %v1181_v1, %v384_v31 }
 0x146   : > { %387 = vst.msk [vmem:[%s386_s16] sm:$0x1] %vm385_vm14, %v1051_v32 }
 0x147 PF: > { %s772_s17 = sshll.u32 %s1023_s1, 1 }
 0x148   : > { %s389_s18 = sadd.s32 1, %s772_s17 }
 0x149   : > { %s1232_s24 = smul.u32 15, %s389_s18 }
 0x14b   : > { %s391_s28 = sld [smem:[#allocation3 + %s1232_s24]] }
 0x14c   : > { %s393_s25 = sld [smem:[#allocation4 + %s1232_s24]] }
 0x151   : > { %p394_p5 = scmp.ge.s32.totalorder %s391_s28, 0  ;;  %p395_p6 = scmp.lt.s32.totalorder %s391_s28, 4 }
 0x153   : > { %p396_p7 = pnand %p395_p6, %p394_p5 }
 0x154   : > { %s690_s27 = scalar_lea.vmem (!%p396_p7), %s1184_s8, %s391_s28 [#allocation8] }
 0x155   : > { %399 = sbr.rel (%p396_p7) target bundleno = 349 (0x15d), region = 92 }
 0x15a   : > { %v400_v33 = vstv %s393_s25  ;;  %v1052_v34 = vmov 0.0  }
 0x15b   : > { %vm401_vm15 = vcmp.eq.s32.totalorder %v1181_v1, %v400_v33 }
 0x15c   : > { %773 = vst.msk [vmem:[%s690_s27 + $0x4] sm:$0x1] %vm401_vm15, %v1052_v34 }
 0x15d PF: > { %s405_s29 = sadd.s32 1, %s1232_s24 }
 0x15e   : > { %s406_s7 = sld [smem:[#allocation3 + %s405_s29]] }
 0x15f   : > { %s408_s30 = sld [smem:[#allocation4 + %s405_s29]] }
 0x164   : > { %p409_p8 = scmp.ge.s32.totalorder %s406_s7, 0  ;;  %p410_p10 = scmp.lt.s32.totalorder %s406_s7, 4 }
 0x166   : > { %p411_p13 = pnand %p410_p10, %p409_p8 }
 0x167   : > { %s692_s9 = scalar_lea.vmem (!%p411_p13), %s1184_s8, %s406_s7 [#allocation8] }
 0x168   : > { %414 = sbr.rel (%p411_p13) target bundleno = 368 (0x170), region = 96 }
 0x16d   : > { %v415_v35 = vstv %s408_s30  ;;  %v1053_v36 = vmov 0.0  }
 0x16e   : > { %vm416_vm0 = vcmp.eq.s32.totalorder %v1181_v1, %v415_v35 }
 0x16f   : > { %774 = vst.msk [vmem:[%s692_s9 + $0x4] sm:$0x1] %vm416_vm0, %v1053_v36 }
 0x170 PF: > { %s420_s10 = sadd.s32 2, %s1232_s24 }
 0x171   : > { %s421_s11 = sld [smem:[#allocation3 + %s420_s10]] }
 0x172   : > { %s423_s12 = sld [smem:[#allocation4 + %s420_s10]] }
 0x177   : > { %p424_p0 = scmp.ge.s32.totalorder %s421_s11, 0  ;;  %p425_p1 = scmp.lt.s32.totalorder %s421_s11, 4 }
 0x179   : > { %p426_p2 = pnand %p425_p1, %p424_p0 }
 0x17a   : > { %s694_s13 = scalar_lea.vmem (!%p426_p2), %s1184_s8, %s421_s11 [#allocation8] }
 0x17b   : > { %429 = sbr.rel (%p426_p2) target bundleno = 387 (0x183), region = 100 }
 0x180   : > { %v430_v37 = vstv %s423_s12  ;;  %v1054_v38 = vmov 0.0  }
 0x181   : > { %vm431_vm1 = vcmp.eq.s32.totalorder %v1181_v1, %v430_v37 }
 0x182   : > { %775 = vst.msk [vmem:[%s694_s13 + $0x4] sm:$0x1] %vm431_vm1, %v1054_v38 }
 0x183 PF: > { %s435_s14 = sadd.s32 3, %s1232_s24 }
 0x184   : > { %s436_s15 = sld [smem:[#allocation3 + %s435_s14]] }
 0x185   : > { %s438_s16 = sld [smem:[#allocation4 + %s435_s14]] }
 0x18a   : > { %p439_p3 = scmp.ge.s32.totalorder %s436_s15, 0  ;;  %p440_p4 = scmp.lt.s32.totalorder %s436_s15, 4 }
 0x18c   : > { %p441_p5 = pnand %p440_p4, %p439_p3 }
 0x18d   : > { %s696_s17 = scalar_lea.vmem (!%p441_p5), %s1184_s8, %s436_s15 [#allocation8] }
 0x18e   : > { %444 = sbr.rel (%p441_p5) target bundleno = 406 (0x196), region = 104 }
 0x193   : > { %v445_v39 = vstv %s438_s16  ;;  %v1055_v40 = vmov 0.0  }
 0x194   : > { %vm446_vm2 = vcmp.eq.s32.totalorder %v1181_v1, %v445_v39 }
 0x195   : > { %776 = vst.msk [vmem:[%s696_s17 + $0x4] sm:$0x1] %vm446_vm2, %v1055_v40 }
 0x196 PF: > { %s450_s18 = sadd.s32 4, %s1232_s24 }
 0x197   : > { %s451_s28 = sld [smem:[#allocation3 + %s450_s18]] }
 0x198   : > { %s453_s25 = sld [smem:[#allocation4 + %s450_s18]] }
 0x19d   : > { %p454_p6 = scmp.ge.s32.totalorder %s451_s28, 0  ;;  %p455_p7 = scmp.lt.s32.totalorder %s451_s28, 4 }
 0x19f   : > { %p456_p8 = pnand %p455_p7, %p454_p6 }
 0x1a0   : > { %s698_s27 = scalar_lea.vmem (!%p456_p8), %s1184_s8, %s451_s28 [#allocation8] }
 0x1a1   : > { %459 = sbr.rel (%p456_p8) target bundleno = 425 (0x1a9), region = 108 }
 0x1a6   : > { %v460_v41 = vstv %s453_s25  ;;  %v1056_v42 = vmov 0.0  }
 0x1a7   : > { %vm461_vm3 = vcmp.eq.s32.totalorder %v1181_v1, %v460_v41 }
 0x1a8   : > { %777 = vst.msk [vmem:[%s698_s27 + $0x4] sm:$0x1] %vm461_vm3, %v1056_v42 }
 0x1a9 PF: > { %s465_s29 = sadd.s32 5, %s1232_s24 }
 0x1aa   : > { %s466_s7 = sld [smem:[#allocation3 + %s465_s29]] }
 0x1ab   : > { %s468_s30 = sld [smem:[#allocation4 + %s465_s29]] }
 0x1b0   : > { %p469_p10 = scmp.ge.s32.totalorder %s466_s7, 0  ;;  %p470_p13 = scmp.lt.s32.totalorder %s466_s7, 4 }
 0x1b2   : > { %p471_p0 = pnand %p470_p13, %p469_p10 }
 0x1b3   : > { %s700_s9 = scalar_lea.vmem (!%p471_p0), %s1184_s8, %s466_s7 [#allocation8] }
 0x1b4   : > { %474 = sbr.rel (%p471_p0) target bundleno = 444 (0x1bc), region = 112 }
 0x1b9   : > { %v475_v43 = vstv %s468_s30  ;;  %v1057_v44 = vmov 0.0  }
 0x1ba   : > { %vm476_vm4 = vcmp.eq.s32.totalorder %v1181_v1, %v475_v43 }
 0x1bb   : > { %778 = vst.msk [vmem:[%s700_s9 + $0x4] sm:$0x1] %vm476_vm4, %v1057_v44 }
 0x1bc PF: > { %s480_s10 = sadd.s32 6, %s1232_s24 }
 0x1bd   : > { %s481_s11 = sld [smem:[#allocation3 + %s480_s10]] }
 0x1be   : > { %s483_s12 = sld [smem:[#allocation4 + %s480_s10]] }
 0x1c3   : > { %p484_p1 = scmp.ge.s32.totalorder %s481_s11, 0  ;;  %p485_p2 = scmp.lt.s32.totalorder %s481_s11, 4 }
 0x1c5   : > { %p486_p3 = pnand %p485_p2, %p484_p1 }
 0x1c6   : > { %s702_s13 = scalar_lea.vmem (!%p486_p3), %s1184_s8, %s481_s11 [#allocation8] }
 0x1c7   : > { %489 = sbr.rel (%p486_p3) target bundleno = 463 (0x1cf), region = 116 }
 0x1cc   : > { %v490_v45 = vstv %s483_s12  ;;  %v1058_v46 = vmov 0.0  }
 0x1cd   : > { %vm491_vm5 = vcmp.eq.s32.totalorder %v1181_v1, %v490_v45 }
 0x1ce   : > { %779 = vst.msk [vmem:[%s702_s13 + $0x4] sm:$0x1] %vm491_vm5, %v1058_v46 }
 0x1cf PF: > { %s495_s14 = sadd.s32 7, %s1232_s24 }
 0x1d0   : > { %s496_s15 = sld [smem:[#allocation3 + %s495_s14]] }
 0x1d1   : > { %s498_s16 = sld [smem:[#allocation4 + %s495_s14]] }
 0x1d6   : > { %p499_p4 = scmp.ge.s32.totalorder %s496_s15, 0  ;;  %p500_p5 = scmp.lt.s32.totalorder %s496_s15, 4 }
 0x1d8   : > { %p501_p6 = pnand %p500_p5, %p499_p4 }
 0x1d9   : > { %s704_s17 = scalar_lea.vmem (!%p501_p6), %s1184_s8, %s496_s15 [#allocation8] }
 0x1da   : > { %504 = sbr.rel (%p501_p6) target bundleno = 482 (0x1e2), region = 120 }
 0x1df   : > { %v505_v47 = vstv %s498_s16  ;;  %v1059_v48 = vmov 0.0  }
 0x1e0   : > { %vm506_vm6 = vcmp.eq.s32.totalorder %v1181_v1, %v505_v47 }
 0x1e1   : > { %780 = vst.msk [vmem:[%s704_s17 + $0x4] sm:$0x1] %vm506_vm6, %v1059_v48 }
 0x1e2 PF: > { %s510_s18 = sadd.s32 8, %s1232_s24 }
 0x1e3   : > { %s511_s28 = sld [smem:[#allocation3 + %s510_s18]] }
 0x1e4   : > { %s513_s25 = sld [smem:[#allocation4 + %s510_s18]] }
 0x1e9   : > { %p514_p7 = scmp.ge.s32.totalorder %s511_s28, 0  ;;  %p515_p8 = scmp.lt.s32.totalorder %s511_s28, 4 }
 0x1eb   : > { %p516_p10 = pnand %p515_p8, %p514_p7 }
 0x1ec   : > { %s706_s27 = scalar_lea.vmem (!%p516_p10), %s1184_s8, %s511_s28 [#allocation8] }
 0x1ed   : > { %519 = sbr.rel (%p516_p10) target bundleno = 501 (0x1f5), region = 124 }
 0x1f2   : > { %v520_v49 = vstv %s513_s25  ;;  %v1060_v50 = vmov 0.0  }
 0x1f3   : > { %vm521_vm7 = vcmp.eq.s32.totalorder %v1181_v1, %v520_v49 }
 0x1f4   : > { %781 = vst.msk [vmem:[%s706_s27 + $0x4] sm:$0x1] %vm521_vm7, %v1060_v50 }
 0x1f5 PF: > { %s525_s29 = sadd.s32 9, %s1232_s24 }
 0x1f6   : > { %s526_s7 = sld [smem:[#allocation3 + %s525_s29]] }
 0x1f7   : > { %s528_s30 = sld [smem:[#allocation4 + %s525_s29]] }
 0x1fc   : > { %p529_p13 = scmp.ge.s32.totalorder %s526_s7, 0  ;;  %p530_p0 = scmp.lt.s32.totalorder %s526_s7, 4 }
 0x1fe   : > { %p531_p1 = pnand %p530_p0, %p529_p13 }
 0x1ff   : > { %s708_s9 = scalar_lea.vmem (!%p531_p1), %s1184_s8, %s526_s7 [#allocation8] }
 0x200   : > { %534 = sbr.rel (%p531_p1) target bundleno = 520 (0x208), region = 128 }
 0x205   : > { %v535_v51 = vstv %s528_s30  ;;  %v1061_v52 = vmov 0.0  }
 0x206   : > { %vm536_vm8 = vcmp.eq.s32.totalorder %v1181_v1, %v535_v51 }
 0x207   : > { %782 = vst.msk [vmem:[%s708_s9 + $0x4] sm:$0x1] %vm536_vm8, %v1061_v52 }
 0x208 PF: > { %s540_s10 = sadd.s32 10, %s1232_s24 }
 0x209   : > { %s541_s11 = sld [smem:[#allocation3 + %s540_s10]] }
 0x20a   : > { %s543_s12 = sld [smem:[#allocation4 + %s540_s10]] }
 0x20f   : > { %p544_p2 = scmp.ge.s32.totalorder %s541_s11, 0  ;;  %p545_p3 = scmp.lt.s32.totalorder %s541_s11, 4 }
 0x211   : > { %p546_p4 = pnand %p545_p3, %p544_p2 }
 0x212   : > { %s710_s13 = scalar_lea.vmem (!%p546_p4), %s1184_s8, %s541_s11 [#allocation8] }
 0x213   : > { %549 = sbr.rel (%p546_p4) target bundleno = 539 (0x21b), region = 132 }
 0x218   : > { %v550_v53 = vstv %s543_s12  ;;  %v1062_v54 = vmov 0.0  }
 0x219   : > { %vm551_vm9 = vcmp.eq.s32.totalorder %v1181_v1, %v550_v53 }
 0x21a   : > { %783 = vst.msk [vmem:[%s710_s13 + $0x4] sm:$0x1] %vm551_vm9, %v1062_v54 }
 0x21b PF: > { %s555_s14 = sadd.s32 11, %s1232_s24 }
 0x21c   : > { %s556_s15 = sld [smem:[#allocation3 + %s555_s14]] }
 0x21d   : > { %s558_s16 = sld [smem:[#allocation4 + %s555_s14]] }
 0x222   : > { %p559_p5 = scmp.ge.s32.totalorder %s556_s15, 0  ;;  %p560_p6 = scmp.lt.s32.totalorder %s556_s15, 4 }
 0x224   : > { %p561_p7 = pnand %p560_p6, %p559_p5 }
 0x225   : > { %s712_s17 = scalar_lea.vmem (!%p561_p7), %s1184_s8, %s556_s15 [#allocation8] }
 0x226   : > { %564 = sbr.rel (%p561_p7) target bundleno = 558 (0x22e), region = 136 }
 0x22b   : > { %v565_v55 = vstv %s558_s16  ;;  %v1063_v56 = vmov 0.0  }
 0x22c   : > { %vm566_vm10 = vcmp.eq.s32.totalorder %v1181_v1, %v565_v55 }
 0x22d   : > { %784 = vst.msk [vmem:[%s712_s17 + $0x4] sm:$0x1] %vm566_vm10, %v1063_v56 }
 0x22e PF: > { %s570_s18 = sadd.s32 12, %s1232_s24 }
 0x22f   : > { %s571_s28 = sld [smem:[#allocation3 + %s570_s18]] }
 0x230   : > { %s573_s25 = sld [smem:[#allocation4 + %s570_s18]] }
 0x235   : > { %p574_p8 = scmp.ge.s32.totalorder %s571_s28, 0  ;;  %p575_p10 = scmp.lt.s32.totalorder %s571_s28, 4 }
 0x237   : > { %p576_p13 = pnand %p575_p10, %p574_p8 }
 0x238   : > { %s714_s27 = scalar_lea.vmem (!%p576_p13), %s1184_s8, %s571_s28 [#allocation8] }
 0x239   : > { %579 = sbr.rel (%p576_p13) target bundleno = 577 (0x241), region = 140 }
 0x23e   : > { %v580_v57 = vstv %s573_s25  ;;  %v1064_v58 = vmov 0.0  }
 0x23f   : > { %vm581_vm11 = vcmp.eq.s32.totalorder %v1181_v1, %v580_v57 }
 0x240   : > { %785 = vst.msk [vmem:[%s714_s27 + $0x4] sm:$0x1] %vm581_vm11, %v1064_v58 }
 0x241 PF: > { %s585_s29 = sadd.s32 13, %s1232_s24 }
 0x242   : > { %s586_s7 = sld [smem:[#allocation3 + %s585_s29]] }
 0x243   : > { %s588_s30 = sld [smem:[#allocation4 + %s585_s29]] }
 0x248   : > { %p589_p0 = scmp.ge.s32.totalorder %s586_s7, 0  ;;  %p590_p1 = scmp.lt.s32.totalorder %s586_s7, 4 }
 0x24a   : > { %p591_p2 = pnand %p590_p1, %p589_p0 }
 0x24b   : > { %s716_s9 = scalar_lea.vmem (!%p591_p2), %s1184_s8, %s586_s7 [#allocation8] }
 0x24c   : > { %594 = sbr.rel (%p591_p2) target bundleno = 596 (0x254), region = 144 }
 0x251   : > { %v595_v59 = vstv %s588_s30  ;;  %v1065_v60 = vmov 0.0  }
 0x252   : > { %vm596_vm12 = vcmp.eq.s32.totalorder %v1181_v1, %v595_v59 }
 0x253   : > { %786 = vst.msk [vmem:[%s716_s9 + $0x4] sm:$0x1] %vm596_vm12, %v1065_v60 }
 0x254 PF: > { %s600_s10 = sadd.s32 14, %s1232_s24 }
 0x255   : > { %s601_s11 = sld [smem:[#allocation3 + %s600_s10]] }
 0x256   : > { %s603_s12 = sld [smem:[#allocation4 + %s600_s10]] }
 0x25b   : > { %p604_p3 = scmp.ge.s32.totalorder %s601_s11, 0  ;;  %p605_p4 = scmp.lt.s32.totalorder %s601_s11, 4 }
 0x25d   : > { %p606_p5 = pnand %p605_p4, %p604_p3 }
 0x25e   : > { %s718_s13 = scalar_lea.vmem (!%p606_p5), %s1184_s8, %s601_s11 [#allocation8] }
 0x25f   : > { %609 = sbr.rel (%p606_p5) target bundleno = 615 (0x267), region = 148 }
 0x264   : > { %v610_v61 = vstv %s603_s12  ;;  %v1066_v62 = vmov 0.0  }
 0x265   : > { %vm611_vm13 = vcmp.eq.s32.totalorder %v1181_v1, %v610_v61 }
 0x266   : > { %787 = vst.msk [vmem:[%s718_s13 + $0x4] sm:$0x1] %vm611_vm13, %v1066_v62 }
 0x267 PF: > { %s794_s14 = sshll.u32 %s1023_s1, 3  ;;  %s629_s17 = sshll.u32 %s1184_s8, 4  ;;  %s630_s17 = int_to_ptr.vmem [resolvable:$true] %s629_s17 }
 0x268   : > { %s628_s16 = scalar_lea.hbm %s1321_s3, %s794_s14  ;;  %s616_s28 = scalar_lea.sflag [#allocation7], %s1169_s19 }
 0x269   : > { %s631_s18 = sshll.u32 %s628_s16, 4  ;;  %s967_s1 = scalar_lea.hbm %s1321_s3, 16  ;;  %s632_s18 = int_to_ptr.hbm [resolvable:$true] %s631_s18 }
 0x26a   : > { %s961_s25 = sshra.s32 %s632_s18, 4  ;;  %s962_s25 = int_to_ptr.hbm [resolvable:$true] %s961_s25 }
 0x26b   : > { %s963_s27 = scalar_lea.hbm %s962_s25, 8  ;;  %p968_p10 = scmp.lt.s32.totalorder %s962_s25, %s1321_s3 }
 0x26c   : > { %p964_p6 = scmp.ne.s32.totalorder %s962_s25, %s963_s27  ;;  %p969_p13 = scmp.lt.s32.totalorder %s967_s1, %s963_s27 }
 0x26e   : > { %p965_p7 = pnand %p964_p6, %p1146_p9  ;;  %p970_p0 = por %p969_p13, %p968_p10 }
 0x270   : > { %p966_p8 = pneg %p965_p7 }
 0x272   : > { %p971_p1 = pnand %p970_p0, %p966_p8 }
 0x274   : > { %974 = shalt.err (!%p971_p1)
}
 0x275   : > { %s1067_s19 = smov 64   ;;  %s1068_s8 = smov 4  }
 0x276   : > { %797 = dma.vmem_to_hbm [thread:$0]  (%p1146_p9), %s630_s17, 128, %s632_s18, %s616_s28, %s1067_s19, %s1067_s19, %s1068_s8  }
 0x277 PF: > { %s646_s10 = sand.u32 1, %s1011_s20   ;;  %p804_p2 = pnand %p765_p12, %p1153_p11 }
 0x278   : > { %s647_s11 = scalar_lea.sflag [#allocation7], %s646_s10 }
 0x279   : > { %p805_p3 = pneg %p804_p2 }
 0x27b   : > { %1006 = dma.done.wait (%p805_p3), %s647_s11, 128  }
 0x27c   : > { %1008 = vsyncadd (%p805_p3), %s647_s11, 4294967168  ;;  %s32_s23 = sadd.s32 1, %s1031_s23   ;;  %s1327_s20 = smov %s1015_s0 }
 0x27d   : > { %p29_p4 = scmp.ge.s32.totalorder %s32_s23, 4   ;;  %s1328_s0 = smov %s1019_s21 }
 0x27e   : > { %s1329_s21 = smov %s1151_s5  ;;  %s1330_s1 = smov %s1027_s22 }
 0x27f   : > { %s1331_s22 = smov %s1333_s26  ;;  %31 = sbr.rel (!%p29_p4) target bundleno = 13 (0xd), region = 219 }
 0x284   :  { %653 = vsyncpa [#allocation6], 1 }
 0x285   :  { %655 = vsyncpa [#allocation6 + $0x1], 1 }
 0x286   :  { %656 = vsyncpa [#allocation7], 1 }
 0x287   :  { %658 = vsyncpa [#allocation7 + $0x1], 1 }

</bundles_post_ra>
